<compile_context>
chip_gen: v7x
topology: tpu7x:2x2x1
jax: 0.10.0
libtpu: 0.0.40
codegen_flags: <defaults>
</compile_context>

<pallas_src>
import functools
import math

import jax
import jax.numpy as jnp
from jax.experimental import pallas as pl
from jax.experimental.pallas import tpu as pltpu


def _round_up(v, m):
    return (v + m - 1) // m * m


@functools.lru_cache(maxsize=None)
def _vmem_limit_bytes():
    """Generation-aware VMEM budget (~3/4 of physical; 48 MiB v7x, 96 MiB v5e/v6e)."""
    try:
        cap = int(pltpu.get_tpu_info().vmem_capacity_bytes)
    except Exception:
        cap = 64 * 1024 * 1024  # v7x-safe fallback (also hit in interpret mode)
    return min(cap * 3 // 4, 100 * 1024 * 1024)


def _x_resident_budget_bytes():
    # Leave headroom for adj double-buffer, accumulator, W, h.
    return _vmem_limit_bytes() // 3


# ---------------------------------------------------------------------------
# Kernel A: tiled (att @ X) accumulation with the PREVIOUS layer's BatchNorm
#           affine folded into the finalize, then Linear + GELU + partial
#           (masked) BatchNorm statistics for THIS layer.
# ---------------------------------------------------------------------------
def _aggr_linear_gelu_kernel(adj_ref, x_ref, w_ref, b_ref,
                             pscale_ref, pshift_ref, ind_ref,   # inputs
                             h_ref, stats_ref,                  # outputs
                             acc_ref,                           # scratch
                             *, n_valid, block_m, block_k, x_resident):
    # NOTE: program_id/num_programs are evaluated at the top level (NOT inside
    # pl.when closures) — required for interpret-mode lowering.
    i = pl.program_id(0)
    k = pl.program_id(1)
    k_last = pl.num_programs(1) - 1

    @pl.when(k == 0)
    def _init():
        acc_ref[...] = jnp.zeros_like(acc_ref)

    if x_resident:
        xs = x_ref[pl.ds(k * block_k, block_k), :]   # X resident: slice in VMEM
    else:
        xs = x_ref[...]                              # X streamed per k tile
    # Pure MXU inner loop: adj rows are pre-normalised, no per-iter reductions.
    acc_ref[...] += jnp.dot(adj_ref[...], xs, preferred_element_type=jnp.float32)

    @pl.when(k == k_last)
    def _finalize():
        # Fold the previous layer's BN affine:
        #   adj @ (h*scale + 1*shift^T) = (adj@h)*scale + rowsum (x) shift,
        # where rowsum == indicator (1 if the node has incoming edges) because
        # the adjacency rows are normalised.
        aggr = acc_ref[...] * pscale_ref[...] + ind_ref[...] * pshift_ref[...]

        h = jnp.dot(aggr.astype(jnp.bfloat16), w_ref[...],
                    preferred_element_type=jnp.float32) + b_ref[...]
        # GELU (tanh approximation), f32 elementwise (v5e has no bf16 VPU/EUP).
        c0 = jnp.float32(0.7978845608028654)  # sqrt(2/pi)
        c1 = jnp.float32(0.044715)
        h = 0.5 * h * (1.0 + jnp.tanh(c0 * (h + c1 * h * h * h)))
        h_ref[...] = h.astype(h_ref.dtype)   # bf16 writeback (stats stay f32)

        # Partial BatchNorm statistics for this node tile, masked to real nodes.
        # (E[x^2]-E[x]^2 in f32 is fine for O(1) post-GELU activations.)
        row = jax.lax.broadcasted_iota(jnp.int32, (block_m, 1), 0) + i * block_m
        valid = (row < n_valid).astype(jnp.float32)
        hm = h * valid
        s1 = jnp.sum(hm, axis=0, keepdims=True)
        s2 = jnp.sum(hm * h, axis=0, keepdims=True)
        pad = jnp.zeros((6, h.shape[1]), jnp.float32)
        # Full 8-sublane slab -> unmasked store.
        stats_ref[...] = jnp.concatenate([s1, s2, pad], axis=0)[None]


# ---------------------------------------------------------------------------
# Kernel B: apply BatchNorm affine  out = h * scale + shift  (last layer only)
# ---------------------------------------------------------------------------
def _bn_apply_kernel(h_ref, scale_ref, shift_ref, o_ref):
    h = h_ref[...].astype(jnp.float32)
    o_ref[...] = (h * scale_ref[...] + shift_ref[...]).astype(o_ref.dtype)


# ---------------------------------------------------------------------------
# Pallas-call wrappers
# ---------------------------------------------------------------------------
def gcn_aggr_linear_gelu(adj, x, w, b, pscale, pshift, ind, *,
                         n_nodes, block_m, block_k):
    n_pad = adj.shape[0]
    fin_pad = x.shape[1]
    fout_pad = w.shape[1]
    assert n_pad % block_m == 0 and n_pad % block_k == 0
    gi = n_pad // block_m
    gk = n_pad // block_k

    x_resident = (n_pad * fin_pad * 2) <= _x_resident_budget_bytes()
    if x_resident:
        x_spec = pl.BlockSpec((n_pad, fin_pad), lambda i, k: (0, 0))
    else:
        x_spec = pl.BlockSpec((block_k, fin_pad), lambda i, k: (k, 0))

    kernel = functools.partial(
        _aggr_linear_gelu_kernel, n_valid=n_nodes, block_m=block_m,
        block_k=block_k, x_resident=x_resident)

    # NOTE: if the xprof trace shows exposed DMA on the adj stream, sweep
    # pipeline_mode=pl.Buffered(3) on the adj BlockSpec.
    return pl.pallas_call(
        kernel,
        out_shape=(
            jax.ShapeDtypeStruct((n_pad, fout_pad), jnp.bfloat16),
            jax.ShapeDtypeStruct((gi, 8, fout_pad), jnp.float32),
        ),
        grid=(gi, gk),
        in_specs=[
            pl.BlockSpec((block_m, block_k), lambda i, k: (i, k)),    # adj tile
            x_spec,                                                   # X
            pl.BlockSpec((fin_pad, fout_pad), lambda i, k: (0, 0)),   # W resident
            pl.BlockSpec((1, fout_pad), lambda i, k: (0, 0)),         # b resident
            pl.BlockSpec((1, fin_pad), lambda i, k: (0, 0)),          # prev scale
            pl.BlockSpec((1, fin_pad), lambda i, k: (0, 0)),          # prev shift
            pl.BlockSpec((block_m, 1), lambda i, k: (i, 0)),          # indicator
        ],
        out_specs=(
            pl.BlockSpec((block_m, fout_pad), lambda i, k: (i, 0)),
            pl.BlockSpec((1, 8, fout_pad), lambda i, k: (i, 0, 0)),
        ),
        scratch_shapes=[pltpu.VMEM((block_m, fin_pad), jnp.float32)],
        compiler_params=pltpu.CompilerParams(
            dimension_semantics=("parallel", "arbitrary"),
            vmem_limit_bytes=_vmem_limit_bytes(),
        ),
    )(adj, x, w, b, pscale, pshift, ind)


def bn_apply(h, scale, shift, *, block_m, out_dtype):
    n_pad, fout_pad = h.shape
    gi = n_pad // block_m
    return pl.pallas_call(
        _bn_apply_kernel,
        out_shape=jax.ShapeDtypeStruct((n_pad, fout_pad), out_dtype),
        grid=(gi,),
        in_specs=[
            pl.BlockSpec((block_m, fout_pad), lambda i: (i, 0)),
            pl.BlockSpec((1, fout_pad), lambda i: (0, 0)),
            pl.BlockSpec((1, fout_pad), lambda i: (0, 0)),
        ],
        out_specs=pl.BlockSpec((block_m, fout_pad), lambda i: (i, 0)),
        compiler_params=pltpu.CompilerParams(
            dimension_semantics=("parallel",),
            vmem_limit_bytes=_vmem_limit_bytes(),
        ),
    )(h, scale, shift)


# ---------------------------------------------------------------------------
# GNN.forward (node_level=True): stack of GCN_Layers
# ---------------------------------------------------------------------------
@functools.partial(jax.jit, static_argnames=("n_nodes", "block_m", "block_k"))
def gnn_forward(node_attr, edge_index, adv_atts, params, *,
                n_nodes, block_m=512, block_k=512):
    src = edge_index[0]  # j (source)
    tgt = edge_index[1]  # i (target)

    # On v7x keep n_pad/block_m a multiple of 2 so both TensorCores get work.
    n_pad = _round_up(n_nodes, math.lcm(block_m, block_k))
    fin0 = node_attr.shape[1]
    fin0_pad = _round_up(fin0, 128)

    # bf16, lane-padded node features.
    x = jnp.zeros((n_pad, fin0_pad), jnp.bfloat16)
    x = x.at[:n_nodes, :fin0].set(node_attr.astype(jnp.bfloat16))

    # Row-sum indicator of the normalised adjacency (1 iff in-degree > 0);
    # identical for all layers since the edge set is fixed.
    indeg = jax.ops.segment_sum(jnp.ones((src.shape[0],), jnp.float32), tgt,
                                num_segments=n_nodes)
    ind = jnp.zeros((n_pad, 1), jnp.float32)
    ind = ind.at[:n_nodes, 0].set((indeg > 0.0).astype(jnp.float32))

    # First layer: previous-BN affine is the identity.
    prev_scale = jnp.ones((1, fin0_pad), jnp.float32)
    prev_shift = jnp.zeros((1, fin0_pad), jnp.float32)

    for (w, b, gamma, beta), adv in zip(params, adv_atts):
        fin, fout = w.shape
        fin_pad = _round_up(fin, 128)
        fout_pad = _round_up(fout, 128)

        w_pad = jnp.zeros((fin_pad, fout_pad), jnp.bfloat16)
        w_pad = w_pad.at[:fin, :fout].set(w.astype(jnp.bfloat16))
        b_pad = jnp.zeros((1, fout_pad), jnp.float32).at[0, :fout].set(b)
        gamma_pad = jnp.zeros((fout_pad,), jnp.float32).at[:fout].set(gamma)
        beta_pad = jnp.zeros((fout_pad,), jnp.float32).at[:fout].set(beta)

        # Exact f32 softmax over incoming edges (O(E)), THEN dense scatter.
        # TODO(synk): replace the dense O(N^2) adjacency with CSR +
        #             PrefetchScalarGridSpec gather for ogbn-arxiv scale.
        att = adv / jax.ops.segment_sum(adv, tgt, num_segments=n_nodes)[tgt]
        adj = jnp.zeros((n_pad, n_pad), jnp.float32).at[tgt, src].add(att)
        adj = adj.astype(jnp.bfloat16)

        h, stats = gcn_aggr_linear_gelu(
            adj, x, w_pad, b_pad, prev_scale, prev_shift, ind,
            n_nodes=n_nodes, block_m=block_m, block_k=block_k)

        # Global training-mode BatchNorm statistics (tiny glue reduce).
        sums = jnp.sum(stats, axis=0)                           # (8, Fout_p)
        mean = sums[0] / n_nodes
        var = jnp.maximum(sums[1] / n_nodes - mean * mean, 0.0)  # biased
        scale = gamma_pad * jax.lax.rsqrt(var + 1e-5)
        shift = beta_pad - mean * scale

        x = h
        prev_scale = scale.reshape(1, -1)
        prev_shift = shift.reshape(1, -1)

    # Only the LAST layer needs an explicit BN-apply pass; intermediate layers
    # had their affine folded into the next layer's aggregation.
    out = bn_apply(x, prev_scale, prev_shift, block_m=block_m,
                   out_dtype=jnp.float32)
    n_out = params[-1][0].shape[1]
    return out[:n_nodes, :n_out]


# ---------------------------------------------------------------------------
# References
# ---------------------------------------------------------------------------
def _gelu_tanh(h):
    c0 = 0.7978845608028654
    return 0.5 * h * (1.0 + jnp.tanh(c0 * (h + 0.044715 * h ** 3)))


def gnn_reference_f32(node_attr, edge_index, adv_atts, params, n_nodes):
    """Pure-f32 segment-op reference (mirrors torch_geometric semantics)."""
    src, tgt = edge_index[0], edge_index[1]
    x = node_attr
    for (w, b, gamma, beta), adv in zip(params, adv_atts):
        denom = jax.ops.segment_sum(adv, tgt, num_segments=n_nodes)[tgt]
        att = adv / denom
        msg = x[src] * att[:, None]
        aggr = jax.ops.segment_sum(msg, tgt, num_segments=n_nodes)
        h = _gelu_tanh(aggr @ w + b)
        mean = h.mean(axis=0, keepdims=True)
        var = ((h - mean) ** 2).mean(axis=0, keepdims=True)
        x = (h - mean) / jnp.sqrt(var + 1e-5) * gamma + beta
    return x


def gnn_reference_matched(node_attr, edge_index, adv_atts, params, n_nodes):
    """Reference mirroring the kernel's bf16-MXU / f32-accumulate / BN-fold math."""
    src, tgt = edge_index[0], edge_index[1]
    indeg = jax.ops.segment_sum(jnp.ones((src.shape[0],), jnp.float32), tgt,
                                num_segments=n_nodes)
    ind = (indeg > 0.0).astype(jnp.float32)[:, None]
    x = node_attr.astype(jnp.bfloat16)
    scale = jnp.ones((1, node_attr.shape[1]), jnp.float32)
    shift = jnp.zeros((1, node_attr.shape[1]), jnp.float32)
    for (w, b, gamma, beta), adv in zip(params, adv_atts):
        att = adv / jax.ops.segment_sum(adv, tgt, num_segments=n_nodes)[tgt]
        adj = jnp.zeros((n_nodes, n_nodes), jnp.float32).at[tgt, src].add(att)
        adj = adj.astype(jnp.bfloat16)
        acc = jnp.dot(adj, x, preferred_element_type=jnp.float32)
        aggr = acc * scale + ind * shift
        h = jnp.dot(aggr.astype(jnp.bfloat16), w.astype(jnp.bfloat16),
                    preferred_element_type=jnp.float32) + b
        h = _gelu_tanh(h)
        mean = jnp.mean(h, axis=0, keepdims=True)
        var = jnp.maximum(jnp.mean(h * h, axis=0, keepdims=True) - mean * mean, 0.0)
        scale = gamma * jax.lax.rsqrt(var + 1e-5)
        shift = beta - mean * scale
        x = h.astype(jnp.bfloat16)
    return x.astype(jnp.float32) * scale + shift


def init_params(key, n_inp, n_hid, n_out, n_layers):
    n_ins = [n_inp] + [n_hid] * (n_layers - 1)
    n_outs = [n_hid] * (n_layers - 1) + [n_out]
    params = []
    for li in range(n_layers):
        key, kw, kb, kg, kbt = jax.random.split(key, 5)
        fan_in, fan_out = n_ins[li], n_outs[li]
        bound = 1.0 / jnp.sqrt(fan_in)
        w = jax.random.uniform(kw, (fan_in, fan_out), jnp.float32, -bound, bound)
        b = jax.random.uniform(kb, (fan_out,), jnp.float32, -bound, bound)
        gamma = 1.0 + 0.1 * jax.random.normal(kg, (fan_out,), jnp.float32)
        beta = 0.1 * jax.random.normal(kbt, (fan_out,), jnp.float32)
        params.append((w, b, gamma, beta))
    return params


if __name__ == "__main__":
    # Small but non-trivial shapes: N not a multiple of the tile (exercises node
    # padding + BN masking), 256-tiles -> a real (2,2) accumulation grid, and
    # feature lane padding (100 -> 128, 40 -> 128).
    N_NODES = 300
    N_EDGES = 1024
    N_INP, N_HID, N_OUT = 100, 128, 40
    N_LAYERS = 3

    key = jax.random.PRNGKey(0)
    key, k_feat, k_edge, k_att = jax.random.split(key, 4)

    node_attr = jax.random.normal(k_feat, (N_NODES, N_INP), jnp.float32)
    edge_index = jax.random.randint(k_edge, (2, N_EDGES), 0, N_NODES, jnp.int32)
    att_keys = jax.random.split(k_att, N_LAYERS)
    adv_atts = tuple(
        jax.random.uniform(att_keys[i], (N_EDGES,), jnp.float32, 0.1, 1.0)
        for i in range(N_LAYERS)
    )
    params = tuple(init_params(key, N_INP, N_HID, N_OUT, N_LAYERS))

    out = gnn_forward(node_attr, edge_index, adv_atts, params,
                      n_nodes=N_NODES, block_m=256, block_k=256)
    out = jax.block_until_ready(out)
    assert out.shape == (N_NODES, N_OUT)
    assert bool(jnp.all(jnp.isfinite(out)))

    ref_m = gnn_reference_matched(node_attr, edge_index, adv_atts, params, N_NODES)
    assert jnp.allclose(out, ref_m, atol=3e-2, rtol=3e-2), \
        "mismatch vs bf16-matched reference"

    ref_f = gnn_reference_f32(node_attr, edge_index, adv_atts, params, N_NODES)
    assert jnp.allclose(out, ref_f, atol=2e-1, rtol=1e-1), \
        "mismatch vs f32 reference"

    print("KERNEL_OK")
</pallas_src>

<mosaic_0001>
module attributes {stable_mosaic.version = 11 : i64} {
  func.func private @main(%arg0: i32) attributes {dimension_semantics = [#tpu.dimension_semantics<core_parallel>], iteration_bounds = array<i64: 2>, tpu.core_type = #tpu.core_type<sc_scalar_subcore>, window_params = []} {
    return
  }
}

module attributes {stable_mosaic.version = 11 : i64} {
  func.func private @main(%arg0: i32) attributes {dimension_semantics = [#tpu.dimension_semantics<core_parallel>], iteration_bounds = array<i64: 2>, tpu.core_type = #tpu.core_type<sc_scalar_subcore>, window_params = []} {
    return
  }
}

module attributes {stable_mosaic.version = 11 : i64} {
  func.func @_aggr_linear_gelu_kernel(%arg0: i32, %arg1: i32, %arg2: memref<256x256xbf16, #tpu.memory_space<vmem>>, %arg3: memref<512x128xbf16, #tpu.memory_space<vmem>>, %arg4: memref<128x128xbf16, #tpu.memory_space<vmem>>, %arg5: memref<1x128xf32, #tpu.memory_space<vmem>>, %arg6: memref<1x128xf32, #tpu.memory_space<vmem>>, %arg7: memref<1x128xf32, #tpu.memory_space<vmem>>, %arg8: memref<256x1xf32, #tpu.memory_space<vmem>>, %arg9: memref<256x128xbf16, #tpu.memory_space<vmem>>, %arg10: memref<1x8x128xf32, #tpu.memory_space<vmem>>, %arg11: memref<256x128xf32, #tpu.memory_space<vmem>>) attributes {dimension_semantics = [#tpu.dimension_semantics<parallel>, #tpu.dimension_semantics<arbitrary>], iteration_bounds = array<i64: 2, 2>, scalar_prefetch = 0 : i64, scratch_operands = 1 : i64, tpu.core_type = #tpu.core_type<tc>, window_params = [{transform_indices = @transform_0, window_bounds = array<i64: 256, 256>}, {pipeline_mode = #tpu.pipeline_mode<synchronous>, transform_indices = @transform_1, window_bounds = array<i64: 512, 128>}, {pipeline_mode = #tpu.pipeline_mode<synchronous>, transform_indices = @transform_2, window_bounds = array<i64: 128, 128>}, {pipeline_mode = #tpu.pipeline_mode<synchronous>, transform_indices = @transform_3, window_bounds = array<i64: 1, 128>}, {pipeline_mode = #tpu.pipeline_mode<synchronous>, transform_indices = @transform_4, window_bounds = array<i64: 1, 128>}, {pipeline_mode = #tpu.pipeline_mode<synchronous>, transform_indices = @transform_5, window_bounds = array<i64: 1, 128>}, {transform_indices = @transform_6, window_bounds = array<i64: 256, 1>}, {transform_indices = @transform_7, window_bounds = array<i64: 256, 128>}, {transform_indices = @transform_8, window_bounds = array<i64: 1, 8, 128>}]} {
    %c0_i32 = arith.constant 0 : i32
    %0 = arith.cmpi eq, %arg1, %c0_i32 : i32
    %1 = arith.extui %0 : i1 to i32
    %c0_i32_0 = arith.constant 0 : i32
    %2 = arith.cmpi ne, %1, %c0_i32_0 : i32
    scf.if %2 {
      %cst_8 = arith.constant 0.000000e+00 : f32
      %14 = vector.broadcast %cst_8 : f32 to vector<256x128xf32>
      %c0_9 = arith.constant 0 : index
      %c0_10 = arith.constant 0 : index
      %15 = vector.load %arg11[%c0_9, %c0_10] : memref<256x128xf32, #tpu.memory_space<vmem>>, vector<256x128xf32>
      tpu.vector_store %arg11[%c0_9, %c0_10], %14 {strides = array<i32>} : memref<256x128xf32, #tpu.memory_space<vmem>>, vector<256x128xf32>,
    } else {
    }
    %c256_i32 = arith.constant 256 : i32
    %3 = arith.muli %arg1, %c256_i32 : i32
    %4 = arith.index_cast %3 : i32 to index
    %c0 = arith.constant 0 : index
    %5 = vector.load %arg3[%4, %c0] : memref<512x128xbf16, #tpu.memory_space<vmem>>, vector<256x128xbf16>
    %c0_1 = arith.constant 0 : index
    %c0_2 = arith.constant 0 : index
    %6 = vector.load %arg11[%c0_1, %c0_2] : memref<256x128xf32, #tpu.memory_space<vmem>>, vector<256x128xf32>
    %c0_3 = arith.constant 0 : index
    %c0_4 = arith.constant 0 : index
    %7 = vector.load %arg2[%c0_3, %c0_4] : memref<256x256xbf16, #tpu.memory_space<vmem>>, vector<256x256xbf16>
    %cst = arith.constant dense<0.000000e+00> : vector<256x128xf32>
    %8 = tpu.matmul %7, %5, %cst {dimension_numbers = #tpu.dot_dimension_numbers<[1], [0], [0], [1], [0, 0, 1, 1], [], []>} : vector<256x256xbf16>, vector<256x128xbf16>, vector<256x128xf32> -> vector<256x128xf32>
    %9 = arith.addf %6, %8 : vector<256x128xf32>
    %c0_5 = arith.constant 0 : index
    %c0_6 = arith.constant 0 : index
    %10 = vector.load %arg11[%c0_5, %c0_6] : memref<256x128xf32, #tpu.memory_space<vmem>>, vector<256x128xf32>
    tpu.vector_store %arg11[%c0_5, %c0_6], %9 {strides = array<i32>} : memref<256x128xf32, #tpu.memory_space<vmem>>, vector<256x128xf32>,
    %c1_i32 = arith.constant 1 : i32
    %11 = arith.cmpi eq, %arg1, %c1_i32 : i32
    %12 = arith.extui %11 : i1 to i32
    %c0_i32_7 = arith.constant 0 : i32
    %13 = arith.cmpi ne, %12, %c0_i32_7 : i32
    scf.if %13 {
      %c0_8 = arith.constant 0 : index
      %c0_9 = arith.constant 0 : index
      %14 = vector.load %arg11[%c0_8, %c0_9] : memref<256x128xf32, #tpu.memory_space<vmem>>, vector<256x128xf32>
      %c0_10 = arith.constant 0 : index
      %c0_11 = arith.constant 0 : index
      %15 = vector.load %arg6[%c0_10, %c0_11] : memref<1x128xf32, #tpu.memory_space<vmem>>, vector<1x128xf32>
      %16 = vector.broadcast %15 : vector<1x128xf32> to vector<256x128xf32>
      %17 = arith.mulf %14, %16 : vector<256x128xf32>
      %c0_12 = arith.constant 0 : index
      %c0_13 = arith.constant 0 : index
      %18 = vector.load %arg8[%c0_12, %c0_13] : memref<256x1xf32, #tpu.memory_space<vmem>>, vector<256x1xf32>
      %c0_14 = arith.constant 0 : index
      %c0_15 = arith.constant 0 : index
      %19 = vector.load %arg7[%c0_14, %c0_15] : memref<1x128xf32, #tpu.memory_space<vmem>>, vector<1x128xf32>
      %20 = vector.broadcast %18 : vector<256x1xf32> to vector<256x128xf32>
      %21 = vector.broadcast %19 : vector<1x128xf32> to vector<256x128xf32>
      %22 = arith.mulf %20, %21 : vector<256x128xf32>
      %23 = arith.addf %17, %22 : vector<256x128xf32>
      %24 = arith.truncf %23 : vector<256x128xf32> to vector<256x128xbf16>
      %c0_16 = arith.constant 0 : index
      %c0_17 = arith.constant 0 : index
      %25 = vector.load %arg4[%c0_16, %c0_17] : memref<128x128xbf16, #tpu.memory_space<vmem>>, vector<128x128xbf16>
      %cst_18 = arith.constant dense<0.000000e+00> : vector<256x128xf32>
      %26 = tpu.matmul %24, %25, %cst_18 {dimension_numbers = #tpu.dot_dimension_numbers<[1], [0], [0], [1], [0, 0, 1, 1], [], []>} : vector<256x128xbf16>, vector<128x128xbf16>, vector<256x128xf32> -> vector<256x128xf32>
      %c0_19 = arith.constant 0 : index
      %c0_20 = arith.constant 0 : index
      %27 = vector.load %arg5[%c0_19, %c0_20] : memref<1x128xf32, #tpu.memory_space<vmem>>, vector<1x128xf32>
      %28 = vector.broadcast %27 : vector<1x128xf32> to vector<256x128xf32>
      %29 = arith.addf %26, %28 : vector<256x128xf32>
      %cst_21 = arith.constant 5.000000e-01 : f32
      %30 = vector.broadcast %cst_21 : f32 to vector<256x128xf32>
      %31 = arith.mulf %30, %29 : vector<256x128xf32>
      %cst_22 = arith.constant 4.471500e-02 : f32
      %32 = vector.broadcast %cst_22 : f32 to vector<256x128xf32>
      %33 = arith.mulf %32, %29 : vector<256x128xf32>
      %34 = arith.mulf %33, %29 : vector<256x128xf32>
      %35 = arith.mulf %34, %29 : vector<256x128xf32>
      %36 = arith.addf %29, %35 : vector<256x128xf32>
      %cst_23 = arith.constant 0.797884583 : f32
      %37 = vector.broadcast %cst_23 : f32 to vector<256x128xf32>
      %38 = arith.mulf %37, %36 : vector<256x128xf32>
      %39 = math.tanh %38 : vector<256x128xf32>
      %cst_24 = arith.constant 1.000000e+00 : f32
      %40 = vector.broadcast %cst_24 : f32 to vector<256x128xf32>
      %41 = arith.addf %40, %39 : vector<256x128xf32>
      %42 = arith.mulf %31, %41 : vector<256x128xf32>
      %43 = arith.truncf %42 : vector<256x128xf32> to vector<256x128xbf16>
      %c0_25 = arith.constant 0 : index
      %c0_26 = arith.constant 0 : index
      %44 = vector.load %arg9[%c0_25, %c0_26] : memref<256x128xbf16, #tpu.memory_space<vmem>>, vector<256x128xbf16>
      tpu.vector_store %arg9[%c0_25, %c0_26], %43 {strides = array<i32>} : memref<256x128xbf16, #tpu.memory_space<vmem>>, vector<256x128xbf16>,
      %45 = tpu.iota {dimensions = array<i32: 0>} : vector<256x1xi32>
      %c256_i32_27 = arith.constant 256 : i32
      %46 = arith.muli %arg0, %c256_i32_27 : i32
      %47 = vector.broadcast %46 : i32 to vector<256x1xi32>
      %48 = arith.addi %45, %47 : vector<256x1xi32>
      %c300_i32 = arith.constant 300 : i32
      %49 = vector.broadcast %c300_i32 : i32 to vector<256x1xi32>
      %50 = arith.cmpi slt, %48, %49 : vector<256x1xi32>
      %51 = arith.extui %50 : vector<256x1xi1> to vector<256x1xi32>
      %52 = arith.sitofp %51 : vector<256x1xi32> to vector<256x1xf32>
      %53 = vector.broadcast %52 : vector<256x1xf32> to vector<256x128xf32>
      %54 = arith.mulf %42, %53 : vector<256x128xf32>
      %cst_28 = arith.constant dense<0.000000e+00> : vector<128xf32>
      %55 = vector.multi_reduction <add>, %54, %cst_28 [0] : vector<256x128xf32> to vector<128xf32>
      %56 = vector.shape_cast %55 : vector<128xf32> to vector<1x128xf32>
      %57 = arith.mulf %54, %42 : vector<256x128xf32>
      %cst_29 = arith.constant dense<0.000000e+00> : vector<128xf32>
      %58 = vector.multi_reduction <add>, %57, %cst_29 [0] : vector<256x128xf32> to vector<128xf32>
      %59 = vector.shape_cast %58 : vector<128xf32> to vector<1x128xf32>
      %cst_30 = arith.constant 0.000000e+00 : f32
      %60 = vector.broadcast %cst_30 : f32 to vector<6x128xf32>
      %61 = tpu.concatenate %56, %59, %60 in 0 : vector<1x128xf32>, vector<1x128xf32>, vector<6x128xf32> -> vector<8x128xf32>
      %62 = vector.shape_cast %61 : vector<8x128xf32> to vector<1x8x128xf32>
      %c0_31 = arith.constant 0 : index
      %c0_32 = arith.constant 0 : index
      %c0_33 = arith.constant 0 : index
      %63 = vector.load %arg10[%c0_31, %c0_32, %c0_33] : memref<1x8x128xf32, #tpu.memory_space<vmem>>, vector<1x8x128xf32>
      tpu.vector_store %arg10[%c0_31, %c0_32, %c0_33], %62 {strides = array<i32>} : memref<1x8x128xf32, #tpu.memory_space<vmem>>, vector<1x8x128xf32>,
    } else {
    }
    return
  }
  func.func @transform_0(%arg0: i32, %arg1: i32) -> (i32, i32) {
    %c0_i32 = arith.constant 0 : i32
    return %arg0, %arg1 : i32, i32
  }
  func.func @transform_1(%arg0: i32, %arg1: i32) -> (i32, i32) {
    %c0_i32 = arith.constant 0 : i32
    %c0_i32_0 = arith.constant 0 : i32
    %c0_i32_1 = arith.constant 0 : i32
    return %c0_i32, %c0_i32_0 : i32, i32
  }
  func.func @transform_2(%arg0: i32, %arg1: i32) -> (i32, i32) {
    %c0_i32 = arith.constant 0 : i32
    %c0_i32_0 = arith.constant 0 : i32
    %c0_i32_1 = arith.constant 0 : i32
    return %c0_i32, %c0_i32_0 : i32, i32
  }
  func.func @transform_3(%arg0: i32, %arg1: i32) -> (i32, i32) {
    %c0_i32 = arith.constant 0 : i32
    %c0_i32_0 = arith.constant 0 : i32
    %c0_i32_1 = arith.constant 0 : i32
    return %c0_i32, %c0_i32_0 : i32, i32
  }
  func.func @transform_4(%arg0: i32, %arg1: i32) -> (i32, i32) {
    %c0_i32 = arith.constant 0 : i32
    %c0_i32_0 = arith.constant 0 : i32
    %c0_i32_1 = arith.constant 0 : i32
    return %c0_i32, %c0_i32_0 : i32, i32
  }
  func.func @transform_5(%arg0: i32, %arg1: i32) -> (i32, i32) {
    %c0_i32 = arith.constant 0 : i32
    %c0_i32_0 = arith.constant 0 : i32
    %c0_i32_1 = arith.constant 0 : i32
    return %c0_i32, %c0_i32_0 : i32, i32
  }
  func.func @transform_6(%arg0: i32, %arg1: i32) -> (i32, i32) {
    %c0_i32 = arith.constant 0 : i32
    %c0_i32_0 = arith.constant 0 : i32
    return %arg0, %c0_i32 : i32, i32
  }
  func.func @transform_7(%arg0: i32, %arg1: i32) -> (i32, i32) {
    %c0_i32 = arith.constant 0 : i32
    %c0_i32_0 = arith.constant 0 : i32
    return %arg0, %c0_i32 : i32, i32
  }
  func.func @transform_8(%arg0: i32, %arg1: i32) -> (i32, i32, i32) {
    %c0_i32 = arith.constant 0 : i32
    %c0_i32_0 = arith.constant 0 : i32
    %c0_i32_1 = arith.constant 0 : i32
    return %arg0, %c0_i32, %c0_i32_0 : i32, i32, i32
  }
}

module attributes {stable_mosaic.version = 11 : i64} {
  func.func @_bn_apply_kernel(%arg0: i32, %arg1: memref<256x128xbf16, #tpu.memory_space<vmem>>, %arg2: memref<1x128xf32, #tpu.memory_space<vmem>>, %arg3: memref<1x128xf32, #tpu.memory_space<vmem>>, %arg4: memref<256x128xf32, #tpu.memory_space<vmem>>) attributes {dimension_semantics = [#tpu.dimension_semantics<parallel>], iteration_bounds = array<i64: 2>, scalar_prefetch = 0 : i64, scratch_operands = 0 : i64, tpu.core_type = #tpu.core_type<tc>, window_params = [{transform_indices = @transform_0, window_bounds = array<i64: 256, 128>}, {pipeline_mode = #tpu.pipeline_mode<synchronous>, transform_indices = @transform_1, window_bounds = array<i64: 1, 128>}, {pipeline_mode = #tpu.pipeline_mode<synchronous>, transform_indices = @transform_2, window_bounds = array<i64: 1, 128>}, {transform_indices = @transform_3, window_bounds = array<i64: 256, 128>}]} {
    %c0 = arith.constant 0 : index
    %c0_0 = arith.constant 0 : index
    %0 = vector.load %arg1[%c0, %c0_0] : memref<256x128xbf16, #tpu.memory_space<vmem>>, vector<256x128xbf16>
    %1 = arith.extf %0 : vector<256x128xbf16> to vector<256x128xf32>
    %c0_1 = arith.constant 0 : index
    %c0_2 = arith.constant 0 : index
    %2 = vector.load %arg2[%c0_1, %c0_2] : memref<1x128xf32, #tpu.memory_space<vmem>>, vector<1x128xf32>
    %3 = vector.broadcast %2 : vector<1x128xf32> to vector<256x128xf32>
    %4 = arith.mulf %1, %3 : vector<256x128xf32>
    %c0_3 = arith.constant 0 : index
    %c0_4 = arith.constant 0 : index
    %5 = vector.load %arg3[%c0_3, %c0_4] : memref<1x128xf32, #tpu.memory_space<vmem>>, vector<1x128xf32>
    %6 = vector.broadcast %5 : vector<1x128xf32> to vector<256x128xf32>
    %7 = arith.addf %4, %6 : vector<256x128xf32>
    %c0_5 = arith.constant 0 : index
    %c0_6 = arith.constant 0 : index
    %8 = vector.load %arg4[%c0_5, %c0_6] : memref<256x128xf32, #tpu.memory_space<vmem>>, vector<256x128xf32>
    tpu.vector_store %arg4[%c0_5, %c0_6], %7 {strides = array<i32>} : memref<256x128xf32, #tpu.memory_space<vmem>>, vector<256x128xf32>,
    return
  }
  func.func @transform_0(%arg0: i32) -> (i32, i32) {
    %c0_i32 = arith.constant 0 : i32
    %c0_i32_0 = arith.constant 0 : i32
    return %arg0, %c0_i32 : i32, i32
  }
  func.func @transform_1(%arg0: i32) -> (i32, i32) {
    %c0_i32 = arith.constant 0 : i32
    %c0_i32_0 = arith.constant 0 : i32
    %c0_i32_1 = arith.constant 0 : i32
    return %c0_i32, %c0_i32_0 : i32, i32
  }
  func.func @transform_2(%arg0: i32) -> (i32, i32) {
    %c0_i32 = arith.constant 0 : i32
    %c0_i32_0 = arith.constant 0 : i32
    %c0_i32_1 = arith.constant 0 : i32
    return %c0_i32, %c0_i32_0 : i32, i32
  }
  func.func @transform_3(%arg0: i32) -> (i32, i32) {
    %c0_i32 = arith.constant 0 : i32
    %c0_i32_0 = arith.constant 0 : i32
    return %arg0, %c0_i32 : i32, i32
  }
}

</mosaic_0001>

<bundles_post_ra>
// kernel: div.9
= control target key start
LH: loop header
LB: loop body
LE: loop exit
PB: predicated region body
PF: predicated region fallthrough
CT: control target
= control target key end

     0   :  { %s37_s0 = inlined_call_operand.vmem [shape: f32[1024], index: 0, kind: input, shape index: {}]   ;;  %s38_s1 = inlined_call_operand.vmem [shape: f32[1024], index: 1, kind: input, shape index: {}]   ;;  %s39_s2 = inlined_call_operand.vmem [shape: f32[1024], index: 2, kind: output, shape index: {}]  }
   0x1   :  { %v4_v0 = vld [vmem:[%s38_s1] sm:$0xff] }
   0x2   :  { %11 = vrcp.f32 %v4_v0  ;;  %v3_v1 = vld [vmem:[%s37_s0] sm:$0xff] }
   0xc   :  { %v12_v2 = vpop.eup %11 }
   0xd   :  { %v8_v3 = vmul.f32 %v12_v2, %v3_v1 }
   0xf   :  { %10 = vst [vmem:[%s39_s2] sm:$0xff] %v8_v3 }

// kernel: gnn_forward.7
= control target key start
LH: loop header
LB: loop body
LE: loop exit
PB: predicated region body
PF: predicated region fallthrough
CT: control target
= control target key end

     0   :  { %s532_s12 = smov 0   ;;  %s675_s0 = inlined_call_operand.vmem [shape: bf16[512,128], index: 0, kind: input, shape index: {}]   ;;  %s676_s1 = inlined_call_operand.vmem [shape: f32[1,128], index: 1, kind: input, shape index: {}]   ;;  %s677_s2 = inlined_call_operand.vmem [shape: f32[1,128], index: 2, kind: input, shape index: {}]   ;;  %s678_s3 = inlined_call_operand.vmem [shape: f32[512,128], index: 3, kind: output, shape index: {}]  }
   0x1 LB: > { %s404_s13 = sadd.s32 4294967295, %s510_s12   ;;  %p408_p0 = scmp.ge.s32.totalorder %s510_s12, 1  ;;  %s510_s12 = sphi %s532_s12, %s13_s12  }
   0x2   : > { %p138_p1 = scmp.lt.s32.totalorder %s510_s12, 3 }
   0x4   : > { %p139_p2 = pnand %p408_p0, %p138_p1 }
   0x5   : > { %s409_s14 = sshll.u32 (!%p139_p2), %s404_s13, 5  ;;  %v548_v0 = vld [vmem:[%s676_s1] ss:$0 sm:$0xff] (!%p139_p2) }
   0x6   : > { %142 = sbr.rel (%p139_p2) target bundleno = 45 (0x2d), region = 32  ;;  %p163_p3 = scmp.lt.s32.totalorder (!%p139_p2), %s409_s14, 63  ;;  %v557_v9 = vld [vmem:[%s677_s2] ss:$0 sm:$0xff] (!%p139_p2) }
   0xd   : > { %s680_s14 = smov (!%p163_p3, %s409_s14), 63 }
   0xe   : > { %s410_s15 = sshll.u32 %s680_s14, 2  ;;  %s412_s21 = sshll.u32 %s680_s14, 3 }
   0xf   : > { %s543_s18 = scalar_lea.vmem %s675_s0, %s410_s15  ;;  %s566_s26 = scalar_lea.vmem %s678_s3, %s412_s21 }
  0x10   : > { %v418_v1 = vld [vmem:[%s543_s18] sm:$0xff]   ;;  %v481_v2 = vld [vmem:[%s543_s18 + $0x8] sm:$0xff]   ;;  %v482_v3 = vld [vmem:[%s543_s18 + $0x10] sm:$0xff]  }
  0x11   : > { %v419_v4 = vunpack.c.l.bf16 %v418_v1  ;;  %v420_v5 = vunpack.c.h.bf16 %v418_v1  ;;  %v423_v6 = vunpack.c.l.bf16 %v481_v2  ;;  %v424_v7 = vunpack.c.h.bf16 %v481_v2  ;;  %v483_v8 = vld [vmem:[%s543_s18 + $0x18] sm:$0xff]   ;;  %v484_v22 = vld [vmem:[%s543_s18 + $0x20] sm:$0xff]   ;;  %v485_v23 = vld [vmem:[%s543_s18 + $0x28] sm:$0xff]  }
  0x12   : > { %v427_v10 = vunpack.c.l.bf16 %v482_v3  ;;  %v428_v11 = vunpack.c.h.bf16 %v482_v3  ;;  %v431_v12 = vunpack.c.l.bf16 %v483_v8  ;;  %v432_v13 = vunpack.c.h.bf16 %v483_v8  ;;  %v486_v28 = vld [vmem:[%s543_s18 + $0x30] sm:$0xff]   ;;  %v487_v29 = vld [vmem:[%s543_s18 + $0x38] sm:$0xff]   ;;  %v488_v50 = vld [vmem:[%s543_s18 + $0x40] sm:$0xff]  }
  0x13   : > { %v245_v14 = vmul.f32 %v419_v4, %v548_v0  ;;  %v246_v15 = vmul.f32 %v420_v5, %v548_v0  ;;  %v247_v16 = vmul.f32 %v423_v6, %v548_v0  ;;  %v248_v17 = vmul.f32 %v424_v7, %v548_v0  ;;  %v489_v51 = vld [vmem:[%s543_s18 + $0x48] sm:$0xff]   ;;  %v490_v56 = vld [vmem:[%s543_s18 + $0x50] sm:$0xff]   ;;  %v491_v57 = vld [vmem:[%s543_s18 + $0x58] sm:$0xff]  }
  0x14   : > { %v249_v18 = vmul.f32 %v427_v10, %v548_v0  ;;  %v250_v19 = vmul.f32 %v428_v11, %v548_v0  ;;  %v251_v20 = vmul.f32 %v431_v12, %v548_v0  ;;  %v252_v21 = vmul.f32 %v432_v13, %v548_v0 }
  0x15   : > { %v284_v24 = vadd.f32 %v557_v9, %v245_v14  ;;  %v285_v25 = vadd.f32 %v557_v9, %v246_v15  ;;  %v286_v26 = vadd.f32 %v557_v9, %v247_v16  ;;  %v287_v27 = vadd.f32 %v557_v9, %v248_v17  ;;  %v492_v16 = vld [vmem:[%s543_s18 + $0x60] sm:$0xff]   ;;  %v493_v17 = vld [vmem:[%s543_s18 + $0x68] sm:$0xff]  }
  0x16   : > { %v288_v30 = vadd.f32 %v557_v9, %v249_v18  ;;  %v289_v31 = vadd.f32 %v557_v9, %v250_v19  ;;  %v290_v32 = vadd.f32 %v557_v9, %v251_v20  ;;  %v291_v33 = vadd.f32 %v557_v9, %v252_v21 }
  0x17   : > { %316 = vst [vmem:[%s566_s26] sm:$0xff] %v284_v24  ;;  %317 = vst [vmem:[%s566_s26 + $0x8] sm:$0xff] %v285_v25  ;;  %v435_v34 = vunpack.c.l.bf16 %v484_v22  ;;  %v436_v35 = vunpack.c.h.bf16 %v484_v22  ;;  %v439_v36 = vunpack.c.l.bf16 %v485_v23  ;;  %v440_v37 = vunpack.c.h.bf16 %v485_v23  ;;  %v494_v22 = vld [vmem:[%s543_s18 + $0x70] sm:$0xff]   ;;  %v495_v23 = vld [vmem:[%s543_s18 + $0x78] sm:$0xff]  }
  0x18   : > { %318 = vst [vmem:[%s566_s26 + $0x10] sm:$0xff] %v286_v26  ;;  %319 = vst [vmem:[%s566_s26 + $0x18] sm:$0xff] %v287_v27  ;;  %v443_v38 = vunpack.c.l.bf16 %v486_v28  ;;  %v444_v39 = vunpack.c.h.bf16 %v486_v28  ;;  %v447_v40 = vunpack.c.l.bf16 %v487_v29  ;;  %v448_v41 = vunpack.c.h.bf16 %v487_v29 }
  0x19   : > { %320 = vst [vmem:[%s566_s26 + $0x20] sm:$0xff] %v288_v30  ;;  %321 = vst [vmem:[%s566_s26 + $0x28] sm:$0xff] %v289_v31  ;;  %v253_v42 = vmul.f32 %v435_v34, %v548_v0  ;;  %v254_v43 = vmul.f32 %v436_v35, %v548_v0  ;;  %v255_v44 = vmul.f32 %v439_v36, %v548_v0  ;;  %v451_v62 = vunpack.c.l.bf16 %v488_v50 }
  0x1a   : > { %322 = vst [vmem:[%s566_s26 + $0x30] sm:$0xff] %v290_v32  ;;  %323 = vst [vmem:[%s566_s26 + $0x38] sm:$0xff] %v291_v33  ;;  %v256_v45 = vmul.f32 %v440_v37, %v548_v0  ;;  %v257_v46 = vmul.f32 %v443_v38, %v548_v0  ;;  %v258_v47 = vmul.f32 %v444_v39, %v548_v0  ;;  %v452_v63 = vunpack.c.h.bf16 %v488_v50 }
  0x1b   : > { %v259_v48 = vmul.f32 %v447_v40, %v548_v0  ;;  %v260_v49 = vmul.f32 %v448_v41, %v548_v0  ;;  %v292_v52 = vadd.f32 %v557_v9, %v253_v42  ;;  %v293_v53 = vadd.f32 %v557_v9, %v254_v43 }
  0x1c   : > { %v294_v54 = vadd.f32 %v557_v9, %v255_v44  ;;  %v295_v55 = vadd.f32 %v557_v9, %v256_v45  ;;  %v296_v58 = vadd.f32 %v557_v9, %v257_v46  ;;  %v297_v59 = vadd.f32 %v557_v9, %v258_v47 }
  0x1d   : > { %v298_v60 = vadd.f32 %v557_v9, %v259_v48  ;;  %v299_v61 = vadd.f32 %v557_v9, %v260_v49  ;;  %324 = vst [vmem:[%s566_s26 + $0x40] sm:$0xff] %v292_v52  ;;  %325 = vst [vmem:[%s566_s26 + $0x48] sm:$0xff] %v293_v53  ;;  %v455_v1 = vunpack.c.l.bf16 %v489_v51  ;;  %v456_v2 = vunpack.c.h.bf16 %v489_v51 }
  0x1e   : > { %326 = vst [vmem:[%s566_s26 + $0x50] sm:$0xff] %v294_v54  ;;  %327 = vst [vmem:[%s566_s26 + $0x58] sm:$0xff] %v295_v55  ;;  %v459_v3 = vunpack.c.l.bf16 %v490_v56  ;;  %v460_v4 = vunpack.c.h.bf16 %v490_v56  ;;  %v463_v5 = vunpack.c.l.bf16 %v491_v57  ;;  %v464_v6 = vunpack.c.h.bf16 %v491_v57 }
  0x1f   : > { %328 = vst [vmem:[%s566_s26 + $0x60] sm:$0xff] %v296_v58  ;;  %329 = vst [vmem:[%s566_s26 + $0x68] sm:$0xff] %v297_v59  ;;  %v261_v7 = vmul.f32 %v451_v62, %v548_v0  ;;  %v262_v8 = vmul.f32 %v452_v63, %v548_v0  ;;  %v263_v10 = vmul.f32 %v455_v1, %v548_v0  ;;  %v467_v28 = vunpack.c.l.bf16 %v492_v16 }
  0x20   : > { %330 = vst [vmem:[%s566_s26 + $0x70] sm:$0xff] %v298_v60  ;;  %331 = vst [vmem:[%s566_s26 + $0x78] sm:$0xff] %v299_v61  ;;  %v264_v11 = vmul.f32 %v456_v2, %v548_v0  ;;  %v265_v12 = vmul.f32 %v459_v3, %v548_v0  ;;  %v266_v13 = vmul.f32 %v460_v4, %v548_v0  ;;  %v468_v29 = vunpack.c.h.bf16 %v492_v16 }
  0x21   : > { %v267_v14 = vmul.f32 %v463_v5, %v548_v0  ;;  %v268_v15 = vmul.f32 %v464_v6, %v548_v0  ;;  %v300_v18 = vadd.f32 %v557_v9, %v261_v7  ;;  %v301_v19 = vadd.f32 %v557_v9, %v262_v8 }
  0x22   : > { %v302_v20 = vadd.f32 %v557_v9, %v263_v10  ;;  %v303_v21 = vadd.f32 %v557_v9, %v264_v11  ;;  %v304_v24 = vadd.f32 %v557_v9, %v265_v12  ;;  %v305_v25 = vadd.f32 %v557_v9, %v266_v13 }
  0x23   : > { %v306_v26 = vadd.f32 %v557_v9, %v267_v14  ;;  %v307_v27 = vadd.f32 %v557_v9, %v268_v15  ;;  %332 = vst [vmem:[%s566_s26 + $0x80] sm:$0xff] %v300_v18  ;;  %333 = vst [vmem:[%s566_s26 + $0x88] sm:$0xff] %v301_v19  ;;  %v471_v30 = vunpack.c.l.bf16 %v493_v17  ;;  %v472_v31 = vunpack.c.h.bf16 %v493_v17 }
  0x24   : > { %334 = vst [vmem:[%s566_s26 + $0x90] sm:$0xff] %v302_v20  ;;  %335 = vst [vmem:[%s566_s26 + $0x98] sm:$0xff] %v303_v21  ;;  %v475_v32 = vunpack.c.l.bf16 %v494_v22  ;;  %v476_v33 = vunpack.c.h.bf16 %v494_v22  ;;  %v479_v34 = vunpack.c.l.bf16 %v495_v23  ;;  %v480_v35 = vunpack.c.h.bf16 %v495_v23 }
  0x25   : > { %336 = vst [vmem:[%s566_s26 + $0xa0] sm:$0xff] %v304_v24  ;;  %337 = vst [vmem:[%s566_s26 + $0xa8] sm:$0xff] %v305_v25  ;;  %v269_v36 = vmul.f32 %v467_v28, %v548_v0  ;;  %v270_v37 = vmul.f32 %v468_v29, %v548_v0  ;;  %v271_v38 = vmul.f32 %v471_v30, %v548_v0 }
  0x26   : > { %338 = vst [vmem:[%s566_s26 + $0xb0] sm:$0xff] %v306_v26  ;;  %339 = vst [vmem:[%s566_s26 + $0xb8] sm:$0xff] %v307_v27  ;;  %v272_v39 = vmul.f32 %v472_v31, %v548_v0  ;;  %v273_v40 = vmul.f32 %v475_v32, %v548_v0  ;;  %v274_v41 = vmul.f32 %v476_v33, %v548_v0 }
  0x27   : > { %v275_v42 = vmul.f32 %v479_v34, %v548_v0  ;;  %v276_v43 = vmul.f32 %v480_v35, %v548_v0  ;;  %v308_v44 = vadd.f32 %v557_v9, %v269_v36  ;;  %v309_v45 = vadd.f32 %v557_v9, %v270_v37 }
  0x28   : > { %v310_v46 = vadd.f32 %v557_v9, %v271_v38  ;;  %v311_v47 = vadd.f32 %v557_v9, %v272_v39  ;;  %v312_v48 = vadd.f32 %v557_v9, %v273_v40  ;;  %v313_v49 = vadd.f32 %v557_v9, %v274_v41 }
  0x29   : > { %v314_v50 = vadd.f32 %v557_v9, %v275_v42  ;;  %v315_v51 = vadd.f32 %v557_v9, %v276_v43  ;;  %340 = vst [vmem:[%s566_s26 + $0xc0] sm:$0xff] %v308_v44  ;;  %341 = vst [vmem:[%s566_s26 + $0xc8] sm:$0xff] %v309_v45 }
  0x2a   : > { %342 = vst [vmem:[%s566_s26 + $0xd0] sm:$0xff] %v310_v46  ;;  %343 = vst [vmem:[%s566_s26 + $0xd8] sm:$0xff] %v311_v47 }
  0x2b   : > { %344 = vst [vmem:[%s566_s26 + $0xe0] sm:$0xff] %v312_v48  ;;  %345 = vst [vmem:[%s566_s26 + $0xe8] sm:$0xff] %v313_v49 }
  0x2c   : > { %346 = vst [vmem:[%s566_s26 + $0xf0] sm:$0xff] %v314_v50  ;;  %347 = vst [vmem:[%s566_s26 + $0xf8] sm:$0xff] %v315_v51 }
  0x2d PF: > { %s13_s12 = sadd.s32 1, %s510_s12  }
  0x2e   : > { %p10_p4 = scmp.ge.s32.totalorder %s13_s12, 4  }
  0x30   :  { %12 = sbr.rel (!%p10_p4) target bundleno = 1 (0x1), region = 62 }

// kernel: gnn_forward.4
= control target key start
LH: loop header
LB: loop body
LE: loop exit
PB: predicated region body
PF: predicated region fallthrough
CT: control target
= control target key end

     0   :  { %s4252_s0 = inlined_call_operand.vmem [shape: bf16[512,512], index: 0, kind: input, shape index: {}]   ;;  %s4253_s1 = inlined_call_operand.vmem [shape: bf16[512,128], index: 1, kind: input, shape index: {}]   ;;  %s4254_s2 = inlined_call_operand.vmem [shape: bf16[128,128], index: 2, kind: input, shape index: {}]   ;;  %s4255_s3 = inlined_call_operand.vmem [shape: f32[1,128], index: 3, kind: input, shape index: {}]   ;;  %s4256_s4 = inlined_call_operand.vmem [shape: f32[1,128], index: 4, kind: input, shape index: {}]   ;;  %s4257_s5 = inlined_call_operand.vmem [shape: f32[1,128], index: 5, kind: input, shape index: {}]   ;;  %s4258_s6 = inlined_call_operand.vmem [shape: f32[512,1], index: 6, kind: input, shape index: {}]   ;;  %s4259_s7 = inlined_call_operand.vmem [shape: bf16[512,128], index: 7, kind: output, shape index: {0}]   ;;  %s4260_s8 = inlined_call_operand.vmem [shape: f32[2,8,128], index: 8, kind: output, shape index: {1}]  }
   0x1   :  { %4265 = sst [smem:[#allocation10_spill]] %s4252_s0 }
   0x2   :  { %s3390_s27 = smov 0   ;;  %s3392_s28 = smov 0  }
   0x3   :  { %s3394_s29 = smov 0   ;;  %s3396_s30 = smov 0  }
   0x4   :  { %s3398_s9 = smov 0   ;;  %s3400_s10 = smov 0  }
   0x5   :  { %s3402_s11 = smov 0  }
   0x6 LB: > { %s28_s12 = sadd.s32 1, %s3332_s9  ;;  %s31_s13 = sadd.s32 1, %s3336_s10  ;;  %s3340_s11 = sphi %s3402_s11, %s19_s11   ;;  %s3336_s10 = sphi %s3400_s10, %s4285_s10   ;;  %s3332_s9 = sphi %s3398_s9, %s4284_s9   ;;  %s3328_s30 = sphi %s3396_s30, %s4283_s30   ;;  %s3324_s29 = sphi %s3394_s29, %s4282_s29   ;;  %s3320_s28 = sphi %s3392_s28, %s4281_s28   ;;  %s3316_s27 = sphi %s3390_s27, %s4280_s27  }
   0x7   : > { %p29_p0 = scmp.ge.s32.totalorder %s28_s12, 2  ;;  %p47_p1 = scmp.ne.s32.totalorder %s3320_s28, %s3316_s27 }
   0x8   : > { %p48_p2 = scmp.eq.s32.totalorder %s3340_s11, 0  ;;  %s40_s17 = sadd.s32 1, %s3320_s28 }
   0x9   : > { %s4287_s12 = smov (%p29_p0, %s28_s12), 0  ;;  %s4289_s13 = smov (!%p29_p0, %s31_s13), %s3336_s10 }
   0xa   : > { %4266 = sst [smem:[#allocation4_spill]] %s4287_s12  ;;  %p49_p3 = por %p48_p2, %p47_p1 }
   0xb   : > { %p33_p4 = scmp.ge.s32.totalorder %s4289_s13, 2  ;;  %s36_s14 = ssub.s32 %s3332_s9, %s4287_s12 }
   0xc   : > { %p2602_p6 = scmp.ge.s32.totalorder %s3340_s11, 4 }
   0xd   : > { %s4291_s13 = smov (%p33_p4, %s4289_s13), 0 }
   0xe   : > { %4267 = sst [smem:[#allocation5_spill]] %s4291_s13  ;;  %s35_s15 = ssub.s32 %s3336_s10, %s4291_s13 }
   0xf   : > { %s37_s16 = sor.u32 %s36_s14, %s35_s15  ;;  %271 = sbr.rel (%p2602_p6) target bundleno = 48 (0x30), region = 36 }
  0x10   : > { %p38_p5 = scmp.eq.s32.totalorder %s37_s16, 0 }
  0x12   : > { %s3441_s18 = scalar_select %p38_p5, %s3320_s28, %s40_s17  }
  0x16   : > { %274 = sbr.rel (!%p49_p3) target bundleno = 48 (0x30), region = 40  ;;  %s276_s19 = sand.u32 (%p49_p3), 1, %s3320_s28  }
  0x17   : > { %s2605_s20 = sshll.u32 (%p49_p3), %s3332_s9, 1  ;;  %s2603_s21 = sshll.u32 (%p49_p3), %s276_s19, 8 }
  0x18   : > { %s2745_s22 = sshll.u32 (%p49_p3), %s3336_s10, 7  ;;  %s4268_s0 = sld [smem:[#allocation10_spill]] (%p49_p3) }
  0x19   : > { %s282_s23 = sadd.s32 (%p49_p3), %s2745_s22, %s2605_s20  ;;  %s3455_s15 = scalar_lea.vmem (%p49_p3), [#allocation3], %s2603_s21 }
  0x1a   : > { %s2607_s24 = sshll.u32 (%p49_p3), %s282_s23, 2 }
  0x1e   : > { %s3450_s14 = scalar_lea.vmem %s4268_s0, %s2607_s24 }
  0x1f   : > { %v374_v0 = vld [vmem:[%s3450_s14] sm:$0xff]  ;;  %v376_v1 = vld [vmem:[%s3450_s14 + $0x10] sm:$0xff] }
  0x20   : > { %v378_v2 = vld [vmem:[%s3450_s14 + $0x20] sm:$0xff]  ;;  %375 = vst [vmem:[%s3455_s15] sm:$0xff] %v374_v0  ;;  %377 = vst [vmem:[%s3455_s15 + $0x8] sm:$0xff] %v376_v1  ;;  %v380_v3 = vld [vmem:[%s3450_s14 + $0x30] sm:$0xff] }
  0x21   : > { %379 = vst [vmem:[%s3455_s15 + $0x10] sm:$0xff] %v378_v2  ;;  %v382_v4 = vld [vmem:[%s3450_s14 + $0x40] sm:$0xff]  ;;  %v384_v5 = vld [vmem:[%s3450_s14 + $0x50] sm:$0xff]  ;;  %381 = vst [vmem:[%s3455_s15 + $0x18] sm:$0xff] %v380_v3 }
  0x22   : > { %383 = vst [vmem:[%s3455_s15 + $0x20] sm:$0xff] %v382_v4  ;;  %385 = vst [vmem:[%s3455_s15 + $0x28] sm:$0xff] %v384_v5  ;;  %v386_v6 = vld [vmem:[%s3450_s14 + $0x60] sm:$0xff]  ;;  %v388_v7 = vld [vmem:[%s3450_s14 + $0x70] sm:$0xff] }
  0x23   : > { %v390_v8 = vld [vmem:[%s3450_s14 + $0x80] sm:$0xff]  ;;  %387 = vst [vmem:[%s3455_s15 + $0x30] sm:$0xff] %v386_v6  ;;  %389 = vst [vmem:[%s3455_s15 + $0x38] sm:$0xff] %v388_v7  ;;  %v392_v9 = vld [vmem:[%s3450_s14 + $0x90] sm:$0xff] }
  0x24   : > { %391 = vst [vmem:[%s3455_s15 + $0x40] sm:$0xff] %v390_v8  ;;  %v394_v10 = vld [vmem:[%s3450_s14 + $0xa0] sm:$0xff]  ;;  %v396_v11 = vld [vmem:[%s3450_s14 + $0xb0] sm:$0xff]  ;;  %393 = vst [vmem:[%s3455_s15 + $0x48] sm:$0xff] %v392_v9 }
  0x25   : > { %395 = vst [vmem:[%s3455_s15 + $0x50] sm:$0xff] %v394_v10  ;;  %397 = vst [vmem:[%s3455_s15 + $0x58] sm:$0xff] %v396_v11  ;;  %v398_v12 = vld [vmem:[%s3450_s14 + $0xc0] sm:$0xff]  ;;  %v400_v13 = vld [vmem:[%s3450_s14 + $0xd0] sm:$0xff] }
  0x26   : > { %v402_v14 = vld [vmem:[%s3450_s14 + $0xe0] sm:$0xff]  ;;  %399 = vst [vmem:[%s3455_s15 + $0x60] sm:$0xff] %v398_v12  ;;  %401 = vst [vmem:[%s3455_s15 + $0x68] sm:$0xff] %v400_v13  ;;  %v404_v15 = vld [vmem:[%s3450_s14 + $0xf0] sm:$0xff] }
  0x27   : > { %403 = vst [vmem:[%s3455_s15 + $0x70] sm:$0xff] %v402_v14  ;;  %v406_v16 = vld [vmem:[%s3450_s14 + $0x100] sm:$0xff]  ;;  %v408_v17 = vld [vmem:[%s3450_s14 + $0x110] sm:$0xff]  ;;  %405 = vst [vmem:[%s3455_s15 + $0x78] sm:$0xff] %v404_v15 }
  0x28   : > { %407 = vst [vmem:[%s3455_s15 + $0x80] sm:$0xff] %v406_v16  ;;  %409 = vst [vmem:[%s3455_s15 + $0x88] sm:$0xff] %v408_v17  ;;  %v410_v18 = vld [vmem:[%s3450_s14 + $0x120] sm:$0xff]  ;;  %v412_v19 = vld [vmem:[%s3450_s14 + $0x130] sm:$0xff] }
  0x29   : > { %v414_v20 = vld [vmem:[%s3450_s14 + $0x140] sm:$0xff]  ;;  %411 = vst [vmem:[%s3455_s15 + $0x90] sm:$0xff] %v410_v18  ;;  %413 = vst [vmem:[%s3455_s15 + $0x98] sm:$0xff] %v412_v19  ;;  %v416_v21 = vld [vmem:[%s3450_s14 + $0x150] sm:$0xff] }
  0x2a   : > { %415 = vst [vmem:[%s3455_s15 + $0xa0] sm:$0xff] %v414_v20  ;;  %v418_v22 = vld [vmem:[%s3450_s14 + $0x160] sm:$0xff]  ;;  %v420_v23 = vld [vmem:[%s3450_s14 + $0x170] sm:$0xff]  ;;  %417 = vst [vmem:[%s3455_s15 + $0xa8] sm:$0xff] %v416_v21 }
  0x2b   : > { %419 = vst [vmem:[%s3455_s15 + $0xb0] sm:$0xff] %v418_v22  ;;  %421 = vst [vmem:[%s3455_s15 + $0xb8] sm:$0xff] %v420_v23  ;;  %v422_v24 = vld [vmem:[%s3450_s14 + $0x180] sm:$0xff]  ;;  %v424_v25 = vld [vmem:[%s3450_s14 + $0x190] sm:$0xff] }
  0x2c   : > { %v426_v26 = vld [vmem:[%s3450_s14 + $0x1a0] sm:$0xff]  ;;  %423 = vst [vmem:[%s3455_s15 + $0xc0] sm:$0xff] %v422_v24  ;;  %425 = vst [vmem:[%s3455_s15 + $0xc8] sm:$0xff] %v424_v25  ;;  %v428_v27 = vld [vmem:[%s3450_s14 + $0x1b0] sm:$0xff] }
  0x2d   : > { %427 = vst [vmem:[%s3455_s15 + $0xd0] sm:$0xff] %v426_v26  ;;  %v430_v28 = vld [vmem:[%s3450_s14 + $0x1c0] sm:$0xff]  ;;  %v432_v29 = vld [vmem:[%s3450_s14 + $0x1d0] sm:$0xff]  ;;  %429 = vst [vmem:[%s3455_s15 + $0xd8] sm:$0xff] %v428_v27 }
  0x2e   : > { %431 = vst [vmem:[%s3455_s15 + $0xe0] sm:$0xff] %v430_v28  ;;  %433 = vst [vmem:[%s3455_s15 + $0xe8] sm:$0xff] %v432_v29  ;;  %v434_v30 = vld [vmem:[%s3450_s14 + $0x1e0] sm:$0xff]  ;;  %v436_v31 = vld [vmem:[%s3450_s14 + $0x1f0] sm:$0xff] }
  0x2f   : > { %435 = vst [vmem:[%s3455_s15 + $0xf0] sm:$0xff] %v434_v30  ;;  %437 = vst [vmem:[%s3455_s15 + $0xf8] sm:$0xff] %v436_v31 }
  0x30 PF: > { %p2608_p7 = scmp.ge.s32.totalorder %s3340_s11, 1  ;;  %p451_p8 = scmp.lt.s32.totalorder %s3340_s11, 5 }
  0x32   : > { %p452_p9 = pnand %p2608_p7, %p451_p8 }
  0x33   : > { %s458_s16 = sand.u32 (!%p452_p9), 1, %s3316_s27   ;;  %s2610_s17 = sshll.u32 (!%p452_p9), %s3328_s30, 5 }
  0x34   : > { %455 = sbr.rel (%p452_p9) target bundleno = 897 (0x381), region = 82  ;;  %s2609_s19 = sshll.u32 (!%p452_p9), %s458_s16, 8 }
  0x35   : > { %p503_p10 = scmp.lt.s32.totalorder (!%p452_p9), %s2610_s17, 63  ;;  %p514_p11 = scmp.lt.s32.totalorder (!%p452_p9), %s3328_s30, 1 }
  0x36   : > { %s3539_s12 = scalar_lea.vmem (!%p452_p9), [#allocation3], %s2609_s19  ;;  %p2615_p12 = scmp.ne.s32.totalorder (!%p452_p9), %s3324_s29, 0 }
  0x3b   : > { %s4293_s17 = smov (!%p503_p10, %s2610_s17), 63  ;;  %522 = sbr.rel (%p2615_p12) target bundleno = 78 (0x4e), region = 90 }
  0x3c   : > { %s515_s20 = scalar_select %p514_p11, %s3328_s30, 1 }
  0x3d   : > { %s2611_s21 = sshll.u32 %s4293_s17, 3  ;;  %s2613_s22 = sshll.u32 %s4293_s17, 2  ;;  %v3342_v32 = vmov (!%p2615_p12), 0.0  }
  0x3e   : > { %s3527_s25 = scalar_lea.vmem %s4258_s6, %s2611_s21  ;;  %s3532_s15 = scalar_lea.vmem %s4259_s7, %s2613_s22  ;;  %523 = vst [vmem:[#allocation2] sm:$0xff] (!%p2615_p12), %v3342_v32  ;;  %524 = vst [vmem:[#allocation2 + $0x8] sm:$0xff] (!%p2615_p12), %v3342_v32 }
  0x3f   : > { %s2614_s0 = sshll.u32 %s515_s20, 3  ;;  %525 = vst [vmem:[#allocation2 + $0x10] sm:$0xff] (!%p2615_p12), %v3342_v32  ;;  %526 = vst [vmem:[#allocation2 + $0x18] sm:$0xff] (!%p2615_p12), %v3342_v32 }
  0x40   : > { %s3537_s16 = scalar_lea.vmem %s4260_s8, %s2614_s0  ;;  %527 = vst [vmem:[#allocation2 + $0x20] sm:$0xff] (!%p2615_p12), %v3342_v32  ;;  %528 = vst [vmem:[#allocation2 + $0x28] sm:$0xff] (!%p2615_p12), %v3342_v32 }
  0x41   : > { %529 = vst [vmem:[#allocation2 + $0x30] sm:$0xff] (!%p2615_p12), %v3342_v32  ;;  %530 = vst [vmem:[#allocation2 + $0x38] sm:$0xff] (!%p2615_p12), %v3342_v32 }
  0x42   : > { %531 = vst [vmem:[#allocation2 + $0x40] sm:$0xff] %v3342_v32  ;;  %532 = vst [vmem:[#allocation2 + $0x48] sm:$0xff] %v3342_v32 }
  0x43   : > { %533 = vst [vmem:[#allocation2 + $0x50] sm:$0xff] %v3342_v32  ;;  %534 = vst [vmem:[#allocation2 + $0x58] sm:$0xff] %v3342_v32 }
  0x44   : > { %535 = vst [vmem:[#allocation2 + $0x60] sm:$0xff] %v3342_v32  ;;  %536 = vst [vmem:[#allocation2 + $0x68] sm:$0xff] %v3342_v32 }
  0x45   : > { %537 = vst [vmem:[#allocation2 + $0x70] sm:$0xff] %v3342_v32  ;;  %538 = vst [vmem:[#allocation2 + $0x78] sm:$0xff] %v3342_v32 }
  0x46   : > { %539 = vst [vmem:[#allocation2 + $0x80] sm:$0xff] %v3342_v32  ;;  %540 = vst [vmem:[#allocation2 + $0x88] sm:$0xff] %v3342_v32 }
  0x47   : > { %541 = vst [vmem:[#allocation2 + $0x90] sm:$0xff] %v3342_v32  ;;  %542 = vst [vmem:[#allocation2 + $0x98] sm:$0xff] %v3342_v32 }
  0x48   : > { %543 = vst [vmem:[#allocation2 + $0xa0] sm:$0xff] %v3342_v32  ;;  %544 = vst [vmem:[#allocation2 + $0xa8] sm:$0xff] %v3342_v32 }
  0x49   : > { %545 = vst [vmem:[#allocation2 + $0xb0] sm:$0xff] %v3342_v32  ;;  %546 = vst [vmem:[#allocation2 + $0xb8] sm:$0xff] %v3342_v32 }
  0x4a   : > { %547 = vst [vmem:[#allocation2 + $0xc0] sm:$0xff] %v3342_v32  ;;  %548 = vst [vmem:[#allocation2 + $0xc8] sm:$0xff] %v3342_v32 }
  0x4b   : > { %549 = vst [vmem:[#allocation2 + $0xd0] sm:$0xff] %v3342_v32  ;;  %550 = vst [vmem:[#allocation2 + $0xd8] sm:$0xff] %v3342_v32 }
  0x4c   : > { %551 = vst [vmem:[#allocation2 + $0xe0] sm:$0xff] %v3342_v32  ;;  %552 = vst [vmem:[#allocation2 + $0xe8] sm:$0xff] %v3342_v32 }
  0x4d   : > { %553 = vst [vmem:[#allocation2 + $0xf0] sm:$0xff] %v3342_v32  ;;  %554 = vst [vmem:[#allocation2 + $0xf8] sm:$0xff] %v3342_v32 }
  0x4e PF: > { %s2616_s0 = sshll.u32 %s3324_s29, 8  ;;  %v3166_v33 = vld [vmem:[%s3539_s12 + $0x4] ss:$8 sps:$4 sm:$0xff]   ;;  %v3164_v51 = vld [vmem:[%s3539_s12] ss:$8 sps:$4 sm:$0xff]   ;;  %p2666_p13 = scmp.ne.s32.totalorder %s3324_s29, 1 }
  0x4f   : > { %s556_s13 = sshra.s32 %s2616_s0, 3  ;;  %v3169_v34 = vld [vmem:[%s3539_s12 + $0x84] ss:$8 sps:$4 sm:$0xff]   ;;  %944 = vmatprep.mubr.bf16.mxu0 %v3166_v33  ;;  %v3167_v52 = vld [vmem:[%s3539_s12 + $0x80] ss:$8 sps:$4 sm:$0xff]  }
  0x50   : > { %s2617_s17 = sshll.u32 %s556_s13, 2  ;;  %1008 = vmatprep.mubr.bf16.mxu1 %v3169_v34  ;;  %v3170_v53 = vld [vmem:[%s3539_s12 + $0x14] ss:$8 sps:$4 sm:$0xff]   ;;  %v3174_v55 = vld [vmem:[%s3539_s12 + $0x10] ss:$8 sps:$4 sm:$0xff]   ;;  %v608_v21 = vld [vmem:[#allocation2 + $0x80] sm:$0xff] }
  0x51   : > { %s3548_s21 = scalar_lea.vmem %s4253_s1, %s2617_s17  ;;  %v3172_v54 = vld [vmem:[%s3539_s12 + $0x94] ss:$8 sps:$4 sm:$0xff]   ;;  %v3175_v56 = vld [vmem:[%s3539_s12 + $0x90] ss:$8 sps:$4 sm:$0xff]   ;;  %v3176_v57 = vld [vmem:[%s3539_s12 + $0x24] ss:$8 sps:$4 sm:$0xff]  }
  0x52   : > { %v3148_v35 = vld [vmem:[%s3548_s21 + $0x40] sm:$0xff]   ;;  %v3150_v37 = vld [vmem:[%s3548_s21 + $0x48] sm:$0xff]   ;;  %v3152_v39 = vld [vmem:[%s3548_s21 + $0x50] sm:$0xff]  }
  0x53   : > { %v3149_v36 = vld [vmem:[%s3548_s21] sm:$0xff]   ;;  %2873 = vmatprep.subr.bf16.mxu0 %v3148_v35  ;;  %3057 = vmatprep.subr.bf16.mxu1 %v3148_v35  ;;  %v3151_v38 = vld [vmem:[%s3548_s21 + $0x8] sm:$0xff]   ;;  %v3153_v40 = vld [vmem:[%s3548_s21 + $0x10] sm:$0xff]  }
  0x54   : > { %2874 = vmatpush3.bf16.msra.mxu0 %v3149_v36  ;;  %3065 = vmatpush3.bf16.msra.mxu1 %v3149_v36  ;;  %v3154_v41 = vld [vmem:[%s3548_s21 + $0x58] sm:$0xff]   ;;  %v3156_v43 = vld [vmem:[%s3548_s21 + $0x60] sm:$0xff]   ;;  %v3158_v45 = vld [vmem:[%s3548_s21 + $0x68] sm:$0xff]  }
  0x55   : > { %2875 = vmatprep.subr.bf16.mxu0 %v3150_v37  ;;  %3058 = vmatprep.subr.bf16.mxu1 %v3150_v37  ;;  %v3155_v42 = vld [vmem:[%s3548_s21 + $0x18] sm:$0xff]   ;;  %v3157_v44 = vld [vmem:[%s3548_s21 + $0x20] sm:$0xff]   ;;  %v3159_v46 = vld [vmem:[%s3548_s21 + $0x28] sm:$0xff]  }
  0x56   : > { %v3160_v47 = vld [vmem:[%s3548_s21 + $0x70] sm:$0xff]   ;;  %v3162_v49 = vld [vmem:[%s3548_s21 + $0x78] sm:$0xff]   ;;  %v3178_v58 = vld [vmem:[%s3539_s12 + $0xa4] ss:$8 sps:$4 sm:$0xff]  }
  0x57   : > { %v3161_v48 = vld [vmem:[%s3548_s21 + $0x30] sm:$0xff]   ;;  %v3163_v50 = vld [vmem:[%s3548_s21 + $0x38] sm:$0xff]   ;;  %v3180_v59 = vld [vmem:[%s3539_s12 + $0x20] ss:$8 sps:$4 sm:$0xff]  }
  0x58   : > { %2876 = vmatpush3.bf16.msra.mxu0 %v3151_v38  ;;  %3066 = vmatpush3.bf16.msra.mxu1 %v3151_v38  ;;  %v3181_v60 = vld [vmem:[%s3539_s12 + $0xa0] ss:$8 sps:$4 sm:$0xff]   ;;  %v3182_v61 = vld [vmem:[%s3539_s12 + $0x34] ss:$8 sps:$4 sm:$0xff]   ;;  %v3186_v63 = vld [vmem:[%s3539_s12 + $0x30] ss:$8 sps:$4 sm:$0xff]  }
  0x59   : > { %2877 = vmatprep.subr.bf16.mxu0 %v3152_v39  ;;  %3059 = vmatprep.subr.bf16.mxu1 %v3152_v39  ;;  %v3184_v62 = vld [vmem:[%s3539_s12 + $0xb4] ss:$8 sps:$4 sm:$0xff]   ;;  %v3187_v0 = vld [vmem:[%s3539_s12 + $0xb0] ss:$8 sps:$4 sm:$0xff]   ;;  %v3188_v1 = vld [vmem:[%s3539_s12 + $0x44] ss:$8 sps:$4 sm:$0xff]  }
  0x5a   : > { %v3190_v2 = vld [vmem:[%s3539_s12 + $0xc4] ss:$8 sps:$4 sm:$0xff]   ;;  %v3192_v3 = vld [vmem:[%s3539_s12 + $0x40] ss:$8 sps:$4 sm:$0xff]   ;;  %v3194_v5 = vld [vmem:[%s3539_s12 + $0x54] ss:$8 sps:$4 sm:$0xff]  }
  0x5b   : > { %v3193_v4 = vld [vmem:[%s3539_s12 + $0xc0] ss:$8 sps:$4 sm:$0xff]   ;;  %v3196_v6 = vld [vmem:[%s3539_s12 + $0xd4] ss:$8 sps:$4 sm:$0xff]   ;;  %v3198_v7 = vld [vmem:[%s3539_s12 + $0x50] ss:$8 sps:$4 sm:$0xff]  }
  0x5c   : > { %2878 = vmatpush3.bf16.msra.mxu0 %v3153_v40  ;;  %3067 = vmatpush3.bf16.msra.mxu1 %v3153_v40  ;;  %v3199_v8 = vld [vmem:[%s3539_s12 + $0xd0] ss:$8 sps:$4 sm:$0xff]   ;;  %v3200_v9 = vld [vmem:[%s3539_s12 + $0x64] ss:$8 sps:$4 sm:$0xff]   ;;  %v3204_v11 = vld [vmem:[%s3539_s12 + $0x60] ss:$8 sps:$4 sm:$0xff]  }
  0x5d   : > { %2879 = vmatprep.subr.bf16.mxu0 %v3154_v41  ;;  %3060 = vmatprep.subr.bf16.mxu1 %v3154_v41  ;;  %v3202_v10 = vld [vmem:[%s3539_s12 + $0xe4] ss:$8 sps:$4 sm:$0xff]   ;;  %v3205_v12 = vld [vmem:[%s3539_s12 + $0xe0] ss:$8 sps:$4 sm:$0xff]   ;;  %v3206_v13 = vld [vmem:[%s3539_s12 + $0x74] ss:$8 sps:$4 sm:$0xff]  }
  0x5e   : > { %v3208_v14 = vld [vmem:[%s3539_s12 + $0xf4] ss:$8 sps:$4 sm:$0xff]   ;;  %v3210_v15 = vld [vmem:[%s3539_s12 + $0x70] ss:$8 sps:$4 sm:$0xff]   ;;  %v592_v19 = vld [vmem:[#allocation2] sm:$0xff] }
  0x5f   : > { %v3211_v16 = vld [vmem:[%s3539_s12 + $0xf0] ss:$8 sps:$4 sm:$0xff]   ;;  %v593_v27 = vld [vmem:[#allocation2 + $0x8] sm:$0xff] }
  0x60   : > { %2880 = vmatpush3.bf16.msra.mxu0 %v3155_v42  ;;  %3068 = vmatpush3.bf16.msra.mxu1 %v3155_v42  ;;  %v609_v29 = vld [vmem:[#allocation2 + $0x88] sm:$0xff]  ;;  %v594_v39 = vld [vmem:[#allocation2 + $0x10] sm:$0xff] }
  0x61   : > { %2881 = vmatprep.subr.bf16.mxu0 %v3156_v43  ;;  %3061 = vmatprep.subr.bf16.mxu1 %v3156_v43  ;;  %v610_v41 = vld [vmem:[#allocation2 + $0x90] sm:$0xff] }
  0x64   : > { %2882 = vmatpush3.bf16.msra.mxu0 %v3157_v44  ;;  %3069 = vmatpush3.bf16.msra.mxu1 %v3157_v44 }
  0x65   : > { %2883 = vmatprep.subr.bf16.mxu0 %v3158_v45  ;;  %3062 = vmatprep.subr.bf16.mxu1 %v3158_v45 }
  0x68   : > { %2884 = vmatpush3.bf16.msra.mxu0 %v3159_v46  ;;  %3070 = vmatpush3.bf16.msra.mxu1 %v3159_v46 }
  0x69   : > { %2885 = vmatprep.subr.bf16.mxu0 %v3160_v47  ;;  %3063 = vmatprep.subr.bf16.mxu1 %v3160_v47  ;;  %v595_v47 = vld [vmem:[#allocation2 + $0x18] sm:$0xff] }
  0x6c   : > { %2886 = vmatpush3.bf16.msra.mxu0 %v3161_v48  ;;  %3071 = vmatpush3.bf16.msra.mxu1 %v3161_v48 }
  0x6d   : > { %2887 = vmatprep.subr.bf16.mxu0 %v3162_v49  ;;  %3064 = vmatprep.subr.bf16.mxu1 %v3162_v49  ;;  %v611_v49 = vld [vmem:[#allocation2 + $0x98] sm:$0xff] }
  0x70   : > { %2888 = vmatpush3.bf16.msra.mxu0 %v3163_v50  ;;  %3072 = vmatpush3.bf16.msra.mxu1 %v3163_v50 }
  0x73   : > { %945 = vmatmul.mubr.bf16.vlgmr.msra.gmra.mrb[0].mxu0 %v3164_v51  ;;  %1009 = vmatmul.mubr.bf16.vlgmr.msra.gmra.mrb[0].mxu1 %v3167_v52 }
  0x74   : > { %952 = vmatprep.mubr.bf16.mxu0 %v3170_v53  ;;  %1016 = vmatprep.mubr.bf16.mxu1 %v3172_v54 }
  0x7b   : > { %953 = vmatmul.mubr.bf16.gmra.mrb[4].mxu0 %v3174_v55  ;;  %1017 = vmatmul.mubr.bf16.gmra.mrb[4].mxu1 %v3175_v56 }
  0x7c   : > { %960 = vmatprep.mubr.bf16.mxu0 %v3176_v57  ;;  %1024 = vmatprep.mubr.bf16.mxu1 %v3178_v58 }
  0x83   : > { %961 = vmatmul.mubr.bf16.gmra.mrb[8].mxu0 %v3180_v59  ;;  %1025 = vmatmul.mubr.bf16.gmra.mrb[8].mxu1 %v3181_v60  ;;  %v596_v59 = vld [vmem:[#allocation2 + $0x20] sm:$0xff] }
  0x84   : > { %968 = vmatprep.mubr.bf16.mxu0 %v3182_v61  ;;  %1032 = vmatprep.mubr.bf16.mxu1 %v3184_v62  ;;  %v612_v61 = vld [vmem:[#allocation2 + $0xa0] sm:$0xff] }
  0x8b   : > { %969 = vmatmul.mubr.bf16.gmra.mrb[12].mxu0 %v3186_v63  ;;  %1033 = vmatmul.mubr.bf16.gmra.mrb[12].mxu1 %v3187_v0 }
  0x8c   : > { %976 = vmatprep.mubr.bf16.mxu0 %v3188_v1  ;;  %1040 = vmatprep.mubr.bf16.mxu1 %v3190_v2 }
  0x93   : > { %977 = vmatmul.mubr.bf16.gmra.mrb[16].mxu0 %v3192_v3  ;;  %1041 = vmatmul.mubr.bf16.gmra.mrb[16].mxu1 %v3193_v4  ;;  %v597_v3 = vld [vmem:[#allocation2 + $0x28] sm:$0xff] }
  0x94   : > { %984 = vmatprep.mubr.bf16.mxu0 %v3194_v5  ;;  %1048 = vmatprep.mubr.bf16.mxu1 %v3196_v6  ;;  %v613_v5 = vld [vmem:[#allocation2 + $0xa8] sm:$0xff] }
  0x9b   : > { %985 = vmatmul.mubr.bf16.gmra.mrb[20].mxu0 %v3198_v7  ;;  %1049 = vmatmul.mubr.bf16.gmra.mrb[20].mxu1 %v3199_v8 }
  0x9c   : > { %992 = vmatprep.mubr.bf16.mxu0 %v3200_v9  ;;  %1056 = vmatprep.mubr.bf16.mxu1 %v3202_v10 }
  0xa3   : > { %993 = vmatmul.mubr.bf16.gmra.mrb[24].mxu0 %v3204_v11  ;;  %1057 = vmatmul.mubr.bf16.gmra.mrb[24].mxu1 %v3205_v12 }
  0xa4   : > { %1000 = vmatprep.mubr.bf16.mxu0 %v3206_v13  ;;  %1064 = vmatprep.mubr.bf16.mxu1 %v3208_v14 }
  0xab   : > { %1001 = vmatmul.mubr.bf16.gmra.mrb[28].mxu0 %v3210_v15  ;;  %1065 = vmatmul.mubr.bf16.gmra.mrb[28].mxu1 %v3211_v16  ;;  %v598_v15 = vld [vmem:[#allocation2 + $0x30] sm:$0xff] }
 0x146   : > { %v2889_v17 = vpop.f32.mrb[0].mxu0  ;;  %v2937_v18 = vpop.f32.mrb[0].mxu1 }
 0x147   : > { %v2890_v20 = vpop.f32.mrb[1].mxu0  ;;  %v2938_v22 = vpop.f32.mrb[1].mxu1 }
 0x148   : > { %v2891_v23 = vadd.f32 %v2890_v20, %v2889_v17  ;;  %v2939_v24 = vadd.f32 %v2938_v22, %v2937_v18  ;;  %v2892_v25 = vpop.f32.mrb[2].mxu0  ;;  %v2940_v26 = vpop.f32.mrb[2].mxu1  ;;  %v614_v17 = vld [vmem:[#allocation2 + $0xb0] sm:$0xff] }
 0x149   : > { %v2893_v28 = vpop.f32.mrb[3].mxu0  ;;  %v2941_v30 = vpop.f32.mrb[3].mxu1 }
 0x14a   : > { %v1073_v31 = vadd.f32 %v2891_v23, %v592_v19  ;;  %v1089_v32 = vadd.f32 %v2939_v24, %v608_v21  ;;  %v2894_v33 = vadd.f32 %v2893_v28, %v2892_v25  ;;  %v2942_v34 = vadd.f32 %v2941_v30, %v2940_v26  ;;  %v599_v23 = vld [vmem:[#allocation2 + $0x38] sm:$0xff] }
 0x14b   : > { %v615_v25 = vld [vmem:[#allocation2 + $0xb8] sm:$0xff] }
 0x14c   : > { %1105 = vst [vmem:[#allocation2] sm:$0xff] %v1073_v31  ;;  %1121 = vst [vmem:[#allocation2 + $0x80] sm:$0xff] %v1089_v32  ;;  %v1074_v35 = vadd.f32 %v2894_v33, %v593_v27  ;;  %v1090_v36 = vadd.f32 %v2942_v34, %v609_v29 }
 0x14e   : > { %1106 = vst [vmem:[#allocation2 + $0x8] sm:$0xff] %v1074_v35  ;;  %1122 = vst [vmem:[#allocation2 + $0x88] sm:$0xff] %v1090_v36  ;;  %v2895_v37 = vpop.f32.mrb[4].mxu0  ;;  %v2943_v38 = vpop.f32.mrb[4].mxu1  ;;  %v600_v35 = vld [vmem:[#allocation2 + $0x40] sm:$0xff] }
 0x14f   : > { %v2896_v40 = vpop.f32.mrb[5].mxu0  ;;  %v2944_v42 = vpop.f32.mrb[5].mxu1 }
 0x150   : > { %v2897_v43 = vadd.f32 %v2896_v40, %v2895_v37  ;;  %v2945_v44 = vadd.f32 %v2944_v42, %v2943_v38  ;;  %v2898_v45 = vpop.f32.mrb[6].mxu0  ;;  %v2946_v46 = vpop.f32.mrb[6].mxu1  ;;  %v616_v37 = vld [vmem:[#allocation2 + $0xc0] sm:$0xff] }
 0x151   : > { %v2899_v48 = vpop.f32.mrb[7].mxu0  ;;  %v2947_v50 = vpop.f32.mrb[7].mxu1 }
 0x152   : > { %v1075_v51 = vadd.f32 %v2897_v43, %v594_v39  ;;  %v1091_v52 = vadd.f32 %v2945_v44, %v610_v41  ;;  %v2900_v53 = vadd.f32 %v2899_v48, %v2898_v45  ;;  %v2948_v54 = vadd.f32 %v2947_v50, %v2946_v46  ;;  %v601_v43 = vld [vmem:[#allocation2 + $0x48] sm:$0xff] }
 0x153   : > { %v617_v45 = vld [vmem:[#allocation2 + $0xc8] sm:$0xff] }
 0x154   : > { %1107 = vst [vmem:[#allocation2 + $0x10] sm:$0xff] %v1075_v51  ;;  %1123 = vst [vmem:[#allocation2 + $0x90] sm:$0xff] %v1091_v52  ;;  %v1076_v55 = vadd.f32 %v2900_v53, %v595_v47  ;;  %v1092_v56 = vadd.f32 %v2948_v54, %v611_v49 }
 0x156   : > { %1108 = vst [vmem:[#allocation2 + $0x18] sm:$0xff] %v1076_v55  ;;  %1124 = vst [vmem:[#allocation2 + $0x98] sm:$0xff] %v1092_v56  ;;  %v2901_v57 = vpop.f32.mrb[8].mxu0  ;;  %v2949_v58 = vpop.f32.mrb[8].mxu1  ;;  %v602_v55 = vld [vmem:[#allocation2 + $0x50] sm:$0xff] }
 0x157   : > { %v2902_v60 = vpop.f32.mrb[9].mxu0  ;;  %v2950_v62 = vpop.f32.mrb[9].mxu1 }
 0x158   : > { %v2903_v63 = vadd.f32 %v2902_v60, %v2901_v57  ;;  %v2951_v0 = vadd.f32 %v2950_v62, %v2949_v58  ;;  %v2904_v1 = vpop.f32.mrb[10].mxu0  ;;  %v2952_v2 = vpop.f32.mrb[10].mxu1  ;;  %v618_v57 = vld [vmem:[#allocation2 + $0xd0] sm:$0xff] }
 0x159   : > { %v2905_v4 = vpop.f32.mrb[11].mxu0  ;;  %v2953_v6 = vpop.f32.mrb[11].mxu1 }
 0x15a   : > { %v1077_v7 = vadd.f32 %v2903_v63, %v596_v59  ;;  %v1093_v8 = vadd.f32 %v2951_v0, %v612_v61  ;;  %v2906_v9 = vadd.f32 %v2905_v4, %v2904_v1  ;;  %v2954_v10 = vadd.f32 %v2953_v6, %v2952_v2  ;;  %v603_v63 = vld [vmem:[#allocation2 + $0x58] sm:$0xff] }
 0x15b   : > { %v619_v1 = vld [vmem:[#allocation2 + $0xd8] sm:$0xff] }
 0x15c   : > { %1109 = vst [vmem:[#allocation2 + $0x20] sm:$0xff] %v1077_v7  ;;  %1125 = vst [vmem:[#allocation2 + $0xa0] sm:$0xff] %v1093_v8  ;;  %v1078_v11 = vadd.f32 %v2906_v9, %v597_v3  ;;  %v1094_v12 = vadd.f32 %v2954_v10, %v613_v5 }
 0x15e   : > { %1110 = vst [vmem:[#allocation2 + $0x28] sm:$0xff] %v1078_v11  ;;  %1126 = vst [vmem:[#allocation2 + $0xa8] sm:$0xff] %v1094_v12  ;;  %v2907_v13 = vpop.f32.mrb[12].mxu0  ;;  %v2955_v14 = vpop.f32.mrb[12].mxu1  ;;  %v604_v11 = vld [vmem:[#allocation2 + $0x60] sm:$0xff] }
 0x15f   : > { %v2908_v16 = vpop.f32.mrb[13].mxu0  ;;  %v2956_v18 = vpop.f32.mrb[13].mxu1 }
 0x160   : > { %v2909_v19 = vadd.f32 %v2908_v16, %v2907_v13  ;;  %v2957_v20 = vadd.f32 %v2956_v18, %v2955_v14  ;;  %v2910_v21 = vpop.f32.mrb[14].mxu0  ;;  %v2958_v22 = vpop.f32.mrb[14].mxu1  ;;  %v620_v13 = vld [vmem:[#allocation2 + $0xe0] sm:$0xff] }
 0x161   : > { %v2911_v24 = vpop.f32.mrb[15].mxu0  ;;  %v2959_v26 = vpop.f32.mrb[15].mxu1 }
 0x162   : > { %v1079_v27 = vadd.f32 %v2909_v19, %v598_v15  ;;  %v1095_v28 = vadd.f32 %v2957_v20, %v614_v17  ;;  %v2912_v29 = vadd.f32 %v2911_v24, %v2910_v21  ;;  %v2960_v30 = vadd.f32 %v2959_v26, %v2958_v22  ;;  %v605_v19 = vld [vmem:[#allocation2 + $0x68] sm:$0xff] }
 0x163   : > { %v621_v21 = vld [vmem:[#allocation2 + $0xe8] sm:$0xff] }
 0x164   : > { %1111 = vst [vmem:[#allocation2 + $0x30] sm:$0xff] %v1079_v27  ;;  %1127 = vst [vmem:[#allocation2 + $0xb0] sm:$0xff] %v1095_v28  ;;  %v1080_v31 = vadd.f32 %v2912_v29, %v599_v23  ;;  %v1096_v32 = vadd.f32 %v2960_v30, %v615_v25 }
 0x166   : > { %1112 = vst [vmem:[#allocation2 + $0x38] sm:$0xff] %v1080_v31  ;;  %1128 = vst [vmem:[#allocation2 + $0xb8] sm:$0xff] %v1096_v32  ;;  %v2913_v33 = vpop.f32.mrb[16].mxu0  ;;  %v2961_v34 = vpop.f32.mrb[16].mxu1  ;;  %v606_v31 = vld [vmem:[#allocation2 + $0x70] sm:$0xff] }
 0x167   : > { %v2914_v36 = vpop.f32.mrb[17].mxu0  ;;  %v2962_v38 = vpop.f32.mrb[17].mxu1 }
 0x168   : > { %v2915_v39 = vadd.f32 %v2914_v36, %v2913_v33  ;;  %v2963_v40 = vadd.f32 %v2962_v38, %v2961_v34  ;;  %v2916_v41 = vpop.f32.mrb[18].mxu0  ;;  %v2964_v42 = vpop.f32.mrb[18].mxu1  ;;  %v622_v33 = vld [vmem:[#allocation2 + $0xf0] sm:$0xff] }
 0x169   : > { %v2917_v44 = vpop.f32.mrb[19].mxu0  ;;  %v2965_v46 = vpop.f32.mrb[19].mxu1 }
 0x16a   : > { %v1081_v47 = vadd.f32 %v2915_v39, %v600_v35  ;;  %v1097_v48 = vadd.f32 %v2963_v40, %v616_v37  ;;  %v2918_v49 = vadd.f32 %v2917_v44, %v2916_v41  ;;  %v2966_v50 = vadd.f32 %v2965_v46, %v2964_v42  ;;  %v607_v39 = vld [vmem:[#allocation2 + $0x78] sm:$0xff] }
 0x16b   : > { %v623_v41 = vld [vmem:[#allocation2 + $0xf8] sm:$0xff] }
 0x16c   : > { %1113 = vst [vmem:[#allocation2 + $0x40] sm:$0xff] %v1081_v47  ;;  %1129 = vst [vmem:[#allocation2 + $0xc0] sm:$0xff] %v1097_v48  ;;  %v1082_v51 = vadd.f32 %v2918_v49, %v601_v43  ;;  %v1098_v52 = vadd.f32 %v2966_v50, %v617_v45 }
 0x16e   : > { %1114 = vst [vmem:[#allocation2 + $0x48] sm:$0xff] %v1082_v51  ;;  %1130 = vst [vmem:[#allocation2 + $0xc8] sm:$0xff] %v1098_v52  ;;  %v2919_v53 = vpop.f32.mrb[20].mxu0  ;;  %v2967_v54 = vpop.f32.mrb[20].mxu1 }
 0x16f   : > { %v2920_v56 = vpop.f32.mrb[21].mxu0  ;;  %v2968_v58 = vpop.f32.mrb[21].mxu1 }
 0x170   : > { %v2921_v59 = vadd.f32 %v2920_v56, %v2919_v53  ;;  %v2969_v60 = vadd.f32 %v2968_v58, %v2967_v54  ;;  %v2922_v61 = vpop.f32.mrb[22].mxu0  ;;  %v2970_v62 = vpop.f32.mrb[22].mxu1 }
 0x171   : > { %v2923_v0 = vpop.f32.mrb[23].mxu0  ;;  %v2971_v2 = vpop.f32.mrb[23].mxu1 }
 0x172   : > { %v1083_v3 = vadd.f32 %v2921_v59, %v602_v55  ;;  %v1099_v4 = vadd.f32 %v2969_v60, %v618_v57  ;;  %v2924_v5 = vadd.f32 %v2923_v0, %v2922_v61  ;;  %v2972_v6 = vadd.f32 %v2971_v2, %v2970_v62 }
 0x174   : > { %1115 = vst [vmem:[#allocation2 + $0x50] sm:$0xff] %v1083_v3  ;;  %1131 = vst [vmem:[#allocation2 + $0xd0] sm:$0xff] %v1099_v4  ;;  %v1084_v7 = vadd.f32 %v2924_v5, %v603_v63  ;;  %v1100_v8 = vadd.f32 %v2972_v6, %v619_v1 }
 0x176   : > { %1116 = vst [vmem:[#allocation2 + $0x58] sm:$0xff] %v1084_v7  ;;  %1132 = vst [vmem:[#allocation2 + $0xd8] sm:$0xff] %v1100_v8  ;;  %v2925_v9 = vpop.f32.mrb[24].mxu0  ;;  %v2973_v10 = vpop.f32.mrb[24].mxu1 }
 0x177   : > { %v2926_v12 = vpop.f32.mrb[25].mxu0  ;;  %v2974_v14 = vpop.f32.mrb[25].mxu1 }
 0x178   : > { %v2927_v15 = vadd.f32 %v2926_v12, %v2925_v9  ;;  %v2975_v16 = vadd.f32 %v2974_v14, %v2973_v10  ;;  %v2928_v17 = vpop.f32.mrb[26].mxu0  ;;  %v2976_v18 = vpop.f32.mrb[26].mxu1 }
 0x179   : > { %v2929_v20 = vpop.f32.mrb[27].mxu0  ;;  %v2977_v22 = vpop.f32.mrb[27].mxu1 }
 0x17a   : > { %v1085_v23 = vadd.f32 %v2927_v15, %v604_v11  ;;  %v1101_v24 = vadd.f32 %v2975_v16, %v620_v13  ;;  %v2930_v25 = vadd.f32 %v2929_v20, %v2928_v17  ;;  %v2978_v26 = vadd.f32 %v2977_v22, %v2976_v18 }
 0x17c   : > { %1117 = vst [vmem:[#allocation2 + $0x60] sm:$0xff] %v1085_v23  ;;  %1133 = vst [vmem:[#allocation2 + $0xe0] sm:$0xff] %v1101_v24  ;;  %v1086_v27 = vadd.f32 %v2930_v25, %v605_v19  ;;  %v1102_v28 = vadd.f32 %v2978_v26, %v621_v21 }
 0x17e   : > { %1118 = vst [vmem:[#allocation2 + $0x68] sm:$0xff] %v1086_v27  ;;  %1134 = vst [vmem:[#allocation2 + $0xe8] sm:$0xff] %v1102_v28  ;;  %v2931_v29 = vpop.f32.mrb[28].mxu0  ;;  %v2979_v30 = vpop.f32.mrb[28].mxu1 }
 0x17f   : > { %v2932_v32 = vpop.f32.mrb[29].mxu0  ;;  %v2980_v34 = vpop.f32.mrb[29].mxu1 }
 0x180   : > { %v2933_v35 = vadd.f32 %v2932_v32, %v2931_v29  ;;  %v2981_v36 = vadd.f32 %v2980_v34, %v2979_v30  ;;  %v2934_v37 = vpop.f32.mrb[30].mxu0  ;;  %v2982_v38 = vpop.f32.mrb[30].mxu1  ;;  %1140 = sbr.rel (%p2666_p13) target bundleno = 897 (0x381), region = 94 }
 0x181   : > { %v2935_v40 = vpop.f32.mrb[31].mxu0  ;;  %v2983_v42 = vpop.f32.mrb[31].mxu1 }
 0x182   : > { %v1087_v43 = vadd.f32 %v2933_v35, %v606_v31  ;;  %v1103_v44 = vadd.f32 %v2981_v36, %v622_v33  ;;  %v2936_v45 = vadd.f32 %v2935_v40, %v2934_v37  ;;  %v2984_v46 = vadd.f32 %v2983_v42, %v2982_v38 }
 0x184   : > { %1119 = vst [vmem:[#allocation2 + $0x70] sm:$0xff] %v1087_v43  ;;  %1135 = vst [vmem:[#allocation2 + $0xf0] sm:$0xff] %v1103_v44  ;;  %v1088_v47 = vadd.f32 %v2936_v45, %v607_v39  ;;  %v1104_v48 = vadd.f32 %v2984_v46, %v623_v41 }
 0x186   : > { %1120 = vst [vmem:[#allocation2 + $0x78] sm:$0xff] %v1088_v47  ;;  %1136 = vst [vmem:[#allocation2 + $0xf8] sm:$0xff] %v1104_v48 }
 0x187   : > { %v1214_v49 = vld [vmem:[%s3527_s25 + $0x10] sm:$0xff]  ;;  %v1212_v50 = vld [vmem:[%s3527_s25] sm:$0xff]  ;;  %v3343_v51 = vmov 0   ;;  %v1215_v52 = vld [vmem:[%s3527_s25 + $0x18] sm:$0xff] }
 0x188   : > { %3213 = vset.pattern.permute.xlu1 %v3343_v51  ;;  %3212 = vset.pattern.permute.xlu0 %v3343_v51  ;;  %v1213_v53 = vld [vmem:[%s3527_s25 + $0x8] sm:$0xff]  ;;  %v1216_v55 = vld [vmem:[%s3527_s25 + $0x20] sm:$0xff]  ;;  %v1219_v56 = vld [vmem:[%s3527_s25 + $0x38] sm:$0xff] }
 0x189   : > { %1257 = vperm.xlu1 %3213, %v1214_v49   ;;  %1247 = vperm.xlu0 %3212, %v1212_v50   ;;  %v1217_v54 = vld [vmem:[%s3527_s25 + $0x28] sm:$0xff]  ;;  %v1218_v57 = vld [vmem:[%s3527_s25 + $0x30] sm:$0xff]  ;;  %v3214_v58 = vld [vmem:[%s4254_s2] sm:$0xff]  }
 0x18a   : > { %v3215_v59 = vld [vmem:[%s4254_s2 + $0x8] sm:$0xff]   ;;  %3009 = vmatprep.subr.bf16.mxu0 %v3214_v58  ;;  %3073 = vmatprep.subr.bf16.mxu1 %v3214_v58  ;;  %v1220_v61 = vld [vmem:[%s3527_s25 + $0x40] sm:$0xff]  ;;  %v3216_v62 = vld [vmem:[%s4254_s2 + $0x10] sm:$0xff]  }
 0x18b   : > { %v1221_v60 = vld [vmem:[%s3527_s25 + $0x48] sm:$0xff]  ;;  %3010 = vmatpush3.bf16.msra.mxu0 %v3214_v58  ;;  %3081 = vmatpush3.bf16.msra.mxu1 %v3214_v58  ;;  %v1223_v63 = vld [vmem:[%s3527_s25 + $0x58] sm:$0xff]  ;;  %v1222_v0 = vld [vmem:[%s3527_s25 + $0x50] sm:$0xff] }
 0x18c   : > { %3011 = vmatprep.subr.bf16.mxu0 %v3215_v59  ;;  %3074 = vmatprep.subr.bf16.mxu1 %v3215_v59  ;;  %v3217_v1 = vld [vmem:[%s4254_s2 + $0x18] sm:$0xff]   ;;  %v1225_v2 = vld [vmem:[%s3527_s25 + $0x68] sm:$0xff]  ;;  %v1224_v3 = vld [vmem:[%s3527_s25 + $0x60] sm:$0xff] }
 0x18d   : > { %1262 = vperm.xlu1 %3213, %v1215_v52   ;;  %1252 = vperm.xlu0 %3212, %v1213_v53   ;;  %v3218_v4 = vld [vmem:[%s4254_s2 + $0x20] sm:$0xff]   ;;  %v1227_v5 = vld [vmem:[%s3527_s25 + $0x78] sm:$0xff]  ;;  %v1226_v6 = vld [vmem:[%s3527_s25 + $0x70] sm:$0xff] }
 0x18e   : > { %v3219_v7 = vld [vmem:[%s4254_s2 + $0x28] sm:$0xff]   ;;  %v1228_v9 = vld [vmem:[%s3527_s25 + $0x80] sm:$0xff]  ;;  %v3220_v10 = vld [vmem:[%s4254_s2 + $0x30] sm:$0xff]  }
 0x18f   : > { %3012 = vmatpush3.bf16.msra.mxu0 %v3215_v59  ;;  %3082 = vmatpush3.bf16.msra.mxu1 %v3215_v59  ;;  %v1229_v8 = vld [vmem:[%s3527_s25 + $0x88] sm:$0xff]  ;;  %v1231_v11 = vld [vmem:[%s3527_s25 + $0x98] sm:$0xff]  ;;  %v1230_v12 = vld [vmem:[%s3527_s25 + $0x90] sm:$0xff] }
 0x190   : > { %3013 = vmatprep.subr.bf16.mxu0 %v3216_v62  ;;  %3075 = vmatprep.subr.bf16.mxu1 %v3216_v62  ;;  %v3221_v13 = vld [vmem:[%s4254_s2 + $0x38] sm:$0xff]   ;;  %v1233_v14 = vld [vmem:[%s3527_s25 + $0xa8] sm:$0xff]  ;;  %v1232_v15 = vld [vmem:[%s3527_s25 + $0xa0] sm:$0xff] }
 0x191   : > { %1272 = vperm.xlu1 %3213, %v1217_v54   ;;  %1267 = vperm.xlu0 %3212, %v1216_v55   ;;  %v1235_v16 = vld [vmem:[%s3527_s25 + $0xb8] sm:$0xff]  ;;  %v1234_v17 = vld [vmem:[%s3527_s25 + $0xb0] sm:$0xff]  ;;  %v1237_v18 = vld [vmem:[%s3527_s25 + $0xc8] sm:$0xff] }
 0x192   : > { %v1236_v19 = vld [vmem:[%s3527_s25 + $0xc0] sm:$0xff]  ;;  %v1239_v20 = vld [vmem:[%s3527_s25 + $0xd8] sm:$0xff]  ;;  %v1238_v21 = vld [vmem:[%s3527_s25 + $0xd0] sm:$0xff] }
 0x193   : > { %3014 = vmatpush3.bf16.msra.mxu0 %v3216_v62  ;;  %3083 = vmatpush3.bf16.msra.mxu1 %v3216_v62  ;;  %v1241_v22 = vld [vmem:[%s3527_s25 + $0xe8] sm:$0xff]  ;;  %v1240_v23 = vld [vmem:[%s3527_s25 + $0xe0] sm:$0xff]  ;;  %v1243_v24 = vld [vmem:[%s3527_s25 + $0xf8] sm:$0xff] }
 0x194   : > { %3015 = vmatprep.subr.bf16.mxu0 %v3217_v1  ;;  %3076 = vmatprep.subr.bf16.mxu1 %v3217_v1  ;;  %v1242_v25 = vld [vmem:[%s3527_s25 + $0xf0] sm:$0xff]  ;;  %v3656_v27 = vld [vmem:[%s4256_s4] ss:$0 sm:$0xff]  ;;  %v1144_v28 = vld [vmem:[#allocation2 + $0x18] sm:$0xff]  ;;  %s2710_s25 = sshll.u32 %s3328_s30, 8 }
 0x195   : > { %1282 = vperm.xlu1 %3213, %v1219_v56   ;;  %1277 = vperm.xlu0 %3212, %v1218_v57   ;;  %v1143_v26 = vld [vmem:[#allocation2 + $0x10] sm:$0xff]  ;;  %v3661_v29 = vld [vmem:[%s4257_s5] ss:$0 sm:$0xff]  ;;  %v1142_v33 = vld [vmem:[#allocation2 + $0x8] sm:$0xff]  ;;  %v1183_v35 = vmul.f32 %v3656_v27, %v1144_v28 }
 0x196   : > { %v1141_v32 = vld [vmem:[#allocation2] sm:$0xff]  ;;  %v1182_v34 = vmul.f32 %v3656_v27, %v1143_v26  ;;  %v1146_v38 = vld [vmem:[#allocation2 + $0x28] sm:$0xff]  ;;  %v1181_v41 = vmul.f32 %v3656_v27, %v1142_v33  ;;  %v1148_v54 = vld [vmem:[#allocation2 + $0x38] sm:$0xff] }
 0x197   : > { %3016 = vmatpush3.bf16.msra.mxu0 %v3217_v1  ;;  %3084 = vmatpush3.bf16.msra.mxu1 %v3217_v1  ;;  %v1145_v39 = vld [vmem:[#allocation2 + $0x20] sm:$0xff]  ;;  %v1180_v40 = vmul.f32 %v3656_v27, %v1141_v32  ;;  %v1185_v46 = vmul.f32 %v3656_v27, %v1146_v38  ;;  %v1147_v55 = vld [vmem:[#allocation2 + $0x30] sm:$0xff]  ;;  %v1187_v62 = vmul.f32 %v3656_v27, %v1148_v54 }
 0x198   : > { %3017 = vmatprep.subr.bf16.mxu0 %v3218_v4  ;;  %3077 = vmatprep.subr.bf16.mxu1 %v3218_v4  ;;  %v1184_v47 = vmul.f32 %v3656_v27, %v1145_v39  ;;  %v1155_v38 = vld [vmem:[#allocation2 + $0x70] sm:$0xff] }
 0x199   : > { %1292 = vperm.xlu1 %3213, %v1221_v60   ;;  %1287 = vperm.xlu0 %3212, %v1220_v61  }
 0x19b   : > { %3018 = vmatpush3.bf16.msra.mxu0 %v3218_v4  ;;  %3085 = vmatpush3.bf16.msra.mxu1 %v3218_v4 }
 0x19c   : > { %3019 = vmatprep.subr.bf16.mxu0 %v3219_v7  ;;  %3078 = vmatprep.subr.bf16.mxu1 %v3219_v7 }
 0x19d   : > { %1302 = vperm.xlu1 %3213, %v1223_v63   ;;  %1297 = vperm.xlu0 %3212, %v1222_v0   ;;  %v1186_v63 = vmul.f32 %v3656_v27, %v1147_v55 }
 0x19f   : > { %3020 = vmatpush3.bf16.msra.mxu0 %v3219_v7  ;;  %3086 = vmatpush3.bf16.msra.mxu1 %v3219_v7 }
 0x1a0   : > { %3021 = vmatprep.subr.bf16.mxu0 %v3220_v10  ;;  %3079 = vmatprep.subr.bf16.mxu1 %v3220_v10 }
 0x1a1   : > { %1312 = vperm.xlu1 %3213, %v1225_v2   ;;  %1307 = vperm.xlu0 %3212, %v1224_v3   ;;  %v1150_v2 = vld [vmem:[#allocation2 + $0x48] sm:$0xff]  ;;  %v1149_v3 = vld [vmem:[#allocation2 + $0x40] sm:$0xff] }
 0x1a3   : > { %3022 = vmatpush3.bf16.msra.mxu0 %v3220_v10  ;;  %3087 = vmatpush3.bf16.msra.mxu1 %v3220_v10  ;;  %v1188_v10 = vmul.f32 %v3656_v27, %v1149_v3 }
 0x1a4   : > { %3023 = vmatprep.subr.bf16.mxu0 %v3221_v13  ;;  %3080 = vmatprep.subr.bf16.mxu1 %v3221_v13 }
 0x1a5   : > { %1322 = vperm.xlu1 %3213, %v1227_v5   ;;  %1317 = vperm.xlu0 %3212, %v1226_v6  }
 0x1a7   : > { %3024 = vmatpush3.bf16.msra.mxu0 %v3221_v13  ;;  %3088 = vmatpush3.bf16.msra.mxu1 %v3221_v13  ;;  %v1152_v13 = vld [vmem:[#allocation2 + $0x58] sm:$0xff] }
 0x1a9   : > { %1332 = vperm.xlu1 %3213, %v1229_v8   ;;  %1327 = vperm.xlu0 %3212, %v1228_v9   ;;  %v1189_v9 = vmul.f32 %v3656_v27, %v1150_v2 }
 0x1ad   : > { %1342 = vperm.xlu1 %3213, %v1231_v11   ;;  %1337 = vperm.xlu0 %3212, %v1230_v12  }
 0x1b1   : > { %1352 = vperm.xlu1 %3213, %v1233_v14   ;;  %1347 = vperm.xlu0 %3212, %v1232_v15   ;;  %v1151_v14 = vld [vmem:[#allocation2 + $0x50] sm:$0xff] }
 0x1b5   : > { %1362 = vperm.xlu1 %3213, %v1235_v16   ;;  %1357 = vperm.xlu0 %3212, %v1234_v17  }
 0x1b9   : > { %1372 = vperm.xlu1 %3213, %v1237_v18   ;;  %1367 = vperm.xlu0 %3212, %v1236_v19  }
 0x1bd   : > { %1382 = vperm.xlu1 %3213, %v1239_v20   ;;  %1377 = vperm.xlu0 %3212, %v1238_v21   ;;  %v1191_v20 = vmul.f32 %v3656_v27, %v1152_v13  ;;  %v1190_v21 = vmul.f32 %v3656_v27, %v1151_v14 }
 0x1c1   : > { %1392 = vperm.xlu1 %3213, %v1241_v22   ;;  %1387 = vperm.xlu0 %3212, %v1240_v23  }
 0x1c5   : > { %1402 = vperm.xlu1 %3213, %v1243_v24   ;;  %1397 = vperm.xlu0 %3212, %v1242_v25   ;;  %v1154_v24 = vld [vmem:[#allocation2 + $0x68] sm:$0xff]  ;;  %v1153_v25 = vld [vmem:[#allocation2 + $0x60] sm:$0xff] }
 0x1c6   : > { %v1193_v33 = vmul.f32 %v3656_v27, %v1154_v24 }
 0x208   : > { %v1258_v30 = vpop.permute.xlu1 %1257  ;;  %v1248_v31 = vpop.permute.xlu0 %1247 }
 0x209   : > { %v1413_v36 = vmul.f32 %v3661_v29, %v1258_v30  ;;  %v1411_v37 = vmul.f32 %v3661_v29, %v1248_v31 }
 0x20b   : > { %v1445_v48 = vadd.f32 %v1413_v36, %v1182_v34  ;;  %v1443_v50 = vadd.f32 %v1411_v37, %v1180_v40  ;;  %v1192_v34 = vmul.f32 %v3656_v27, %v1153_v25  ;;  %v1156_v37 = vld [vmem:[#allocation2 + $0x78] sm:$0xff] }
 0x20c   : > { %v1263_v42 = vpop.permute.xlu1 %1262  ;;  %v1253_v43 = vpop.permute.xlu0 %1252 }
 0x20d   : > { %v1414_v44 = vmul.f32 %v3661_v29, %v1263_v42  ;;  %v1412_v45 = vmul.f32 %v3661_v29, %v1253_v43 }
 0x20f   : > { %v1446_v49 = vadd.f32 %v1414_v44, %v1183_v35  ;;  %v1444_v51 = vadd.f32 %v1412_v45, %v1181_v41  ;;  %v1195_v44 = vmul.f32 %v3656_v27, %v1156_v37  ;;  %v1194_v45 = vmul.f32 %v3656_v27, %v1155_v38 }
 0x210   : > { %v1273_v52 = vpop.permute.xlu1 %1272  ;;  %v1268_v53 = vpop.permute.xlu0 %1267 }
 0x211   : > { %v1416_v56 = vmul.f32 %v3661_v29, %v1273_v52  ;;  %v1415_v57 = vmul.f32 %v3661_v29, %v1268_v53  ;;  %v1475_v58 = vpack.c.bf16 %v1444_v51, %v1443_v50  ;;  %v1476_v59 = vpack.c.bf16 %v1446_v49, %v1445_v48  ;;  %v1157_v48 = vld [vmem:[#allocation2 + $0x80] sm:$0xff]  ;;  %v1158_v49 = vld [vmem:[#allocation2 + $0x88] sm:$0xff] }
 0x212   : > { %v1196_v55 = vmul.f32 %v3656_v27, %v1157_v48 }
 0x213   : > { %v1448_v60 = vadd.f32 %v1416_v56, %v1185_v46  ;;  %v1447_v61 = vadd.f32 %v1415_v57, %v1184_v47  ;;  %3025 = vmatprep.mubr.bf16.mxu0 %v1475_v58  ;;  %v1197_v56 = vmul.f32 %v3656_v27, %v1158_v49 }
 0x214   : > { %v1283_v0 = vpop.permute.xlu1 %1282  ;;  %v1278_v1 = vpop.permute.xlu0 %1277  ;;  %3026 = vmatmul.mubr.bf16.vlgmr.msra.gmra.mrb[0].mxu0 %v1476_v59  ;;  %v1160_v59 = vld [vmem:[#allocation2 + $0x98] sm:$0xff] }
 0x215   : > { %v1418_v4 = vmul.f32 %v3661_v29, %v1283_v0  ;;  %v1417_v5 = vmul.f32 %v3661_v29, %v1278_v1  ;;  %v1477_v6 = vpack.c.bf16 %v1448_v60, %v1447_v61  ;;  %v1159_v60 = vld [vmem:[#allocation2 + $0x90] sm:$0xff]  ;;  %v1199_v0 = vmul.f32 %v3656_v27, %v1160_v59 }
 0x216   : > { %v1198_v1 = vmul.f32 %v3656_v27, %v1159_v60 }
 0x217   : > { %v1450_v7 = vadd.f32 %v1418_v4, %v1187_v62  ;;  %v1449_v8 = vadd.f32 %v1417_v5, %v1186_v63  ;;  %3029 = vmatprep.mubr.bf16.mxu0 %v1477_v6  ;;  %v1162_v6 = vld [vmem:[#allocation2 + $0xa8] sm:$0xff] }
 0x218   : > { %v1293_v11 = vpop.permute.xlu1 %1292  ;;  %v1288_v12 = vpop.permute.xlu0 %1287  ;;  %v1201_v13 = vmul.f32 %v3656_v27, %v1162_v6 }
 0x219   : > { %v1420_v15 = vmul.f32 %v3661_v29, %v1293_v11  ;;  %v1419_v16 = vmul.f32 %v3661_v29, %v1288_v12  ;;  %v1478_v17 = vpack.c.bf16 %v1450_v7, %v1449_v8  ;;  %v1161_v7 = vld [vmem:[#allocation2 + $0xa0] sm:$0xff] }
 0x21a   : > { %v1200_v14 = vmul.f32 %v3656_v27, %v1161_v7 }
 0x21b   : > { %v1452_v18 = vadd.f32 %v1420_v15, %v1189_v9  ;;  %v1451_v19 = vadd.f32 %v1419_v16, %v1188_v10 }
 0x21c   : > { %v1303_v22 = vpop.permute.xlu1 %1302  ;;  %v1298_v23 = vpop.permute.xlu0 %1297  ;;  %3030 = vmatmul.mubr.bf16.gmra.mrb[4].mxu0 %v1478_v17  ;;  %v1164_v17 = vld [vmem:[#allocation2 + $0xb8] sm:$0xff] }
 0x21d   : > { %v1422_v26 = vmul.f32 %v3661_v29, %v1303_v22  ;;  %v1421_v28 = vmul.f32 %v3661_v29, %v1298_v23  ;;  %v1479_v30 = vpack.c.bf16 %v1452_v18, %v1451_v19  ;;  %v1163_v18 = vld [vmem:[#allocation2 + $0xb0] sm:$0xff]  ;;  %v1203_v24 = vmul.f32 %v3656_v27, %v1164_v17 }
 0x21e   : > { %v1202_v25 = vmul.f32 %v3656_v27, %v1163_v18 }
 0x21f   : > { %v1454_v31 = vadd.f32 %v1422_v26, %v1191_v20  ;;  %v1453_v32 = vadd.f32 %v1421_v28, %v1190_v21  ;;  %3033 = vmatprep.mubr.bf16.mxu0 %v1479_v30  ;;  %v1166_v30 = vld [vmem:[#allocation2 + $0xc8] sm:$0xff] }
 0x220   : > { %v1313_v35 = vpop.permute.xlu1 %1312  ;;  %v1308_v36 = vpop.permute.xlu0 %1307  ;;  %v1205_v37 = vmul.f32 %v3656_v27, %v1166_v30 }
 0x221   : > { %v1424_v39 = vmul.f32 %v3661_v29, %v1313_v35  ;;  %v1423_v40 = vmul.f32 %v3661_v29, %v1308_v36  ;;  %v1480_v41 = vpack.c.bf16 %v1454_v31, %v1453_v32  ;;  %v1165_v31 = vld [vmem:[#allocation2 + $0xc0] sm:$0xff] }
 0x222   : > { %v1204_v38 = vmul.f32 %v3656_v27, %v1165_v31 }
 0x223   : > { %v1456_v42 = vadd.f32 %v1424_v39, %v1193_v33  ;;  %v1455_v43 = vadd.f32 %v1423_v40, %v1192_v34 }
 0x224   : > { %v1323_v46 = vpop.permute.xlu1 %1322  ;;  %v1318_v47 = vpop.permute.xlu0 %1317  ;;  %3034 = vmatmul.mubr.bf16.gmra.mrb[8].mxu0 %v1480_v41  ;;  %v1168_v41 = vld [vmem:[#allocation2 + $0xd8] sm:$0xff] }
 0x225   : > { %v1426_v50 = vmul.f32 %v3661_v29, %v1323_v46  ;;  %v1425_v51 = vmul.f32 %v3661_v29, %v1318_v47  ;;  %v1481_v52 = vpack.c.bf16 %v1456_v42, %v1455_v43  ;;  %v1167_v42 = vld [vmem:[#allocation2 + $0xd0] sm:$0xff]  ;;  %v1207_v48 = vmul.f32 %v3656_v27, %v1168_v41 }
 0x226   : > { %v1206_v49 = vmul.f32 %v3656_v27, %v1167_v42 }
 0x227   : > { %v1458_v53 = vadd.f32 %v1426_v50, %v1195_v44  ;;  %v1457_v54 = vadd.f32 %v1425_v51, %v1194_v45  ;;  %3037 = vmatprep.mubr.bf16.mxu0 %v1481_v52  ;;  %v1170_v52 = vld [vmem:[#allocation2 + $0xe8] sm:$0xff] }
 0x228   : > { %v1333_v57 = vpop.permute.xlu1 %1332  ;;  %v1328_v58 = vpop.permute.xlu0 %1327  ;;  %v1209_v59 = vmul.f32 %v3656_v27, %v1170_v52 }
 0x229   : > { %v1428_v61 = vmul.f32 %v3661_v29, %v1333_v57  ;;  %v1427_v62 = vmul.f32 %v3661_v29, %v1328_v58  ;;  %v1482_v63 = vpack.c.bf16 %v1458_v53, %v1457_v54  ;;  %v1169_v53 = vld [vmem:[#allocation2 + $0xe0] sm:$0xff] }
 0x22a   : > { %v1208_v60 = vmul.f32 %v3656_v27, %v1169_v53 }
 0x22b   : > { %v1459_v2 = vadd.f32 %v1427_v62, %v1196_v55  ;;  %v1460_v3 = vadd.f32 %v1428_v61, %v1197_v56 }
 0x22c   : > { %v1343_v4 = vpop.permute.xlu1 %1342  ;;  %v1338_v5 = vpop.permute.xlu0 %1337  ;;  %3038 = vmatmul.mubr.bf16.gmra.mrb[12].mxu0 %v1482_v63  ;;  %v1172_v63 = vld [vmem:[#allocation2 + $0xf8] sm:$0xff] }
 0x22d   : > { %v1430_v8 = vmul.f32 %v3661_v29, %v1343_v4  ;;  %v1429_v9 = vmul.f32 %v3661_v29, %v1338_v5  ;;  %v1483_v10 = vpack.c.bf16 %v1460_v3, %v1459_v2  ;;  %v1211_v6 = vmul.f32 %v3656_v27, %v1172_v63 }
 0x22f   : > { %v1462_v11 = vadd.f32 %v1430_v8, %v1199_v0  ;;  %v1461_v12 = vadd.f32 %v1429_v9, %v1198_v1  ;;  %3041 = vmatprep.mubr.bf16.mxu1 %v1483_v10  ;;  %v1171_v0 = vld [vmem:[#allocation2 + $0xf0] sm:$0xff] }
 0x230   : > { %v1353_v15 = vpop.permute.xlu1 %1352  ;;  %v1348_v16 = vpop.permute.xlu0 %1347  ;;  %v1210_v7 = vmul.f32 %v3656_v27, %v1171_v0 }
 0x231   : > { %v1432_v19 = vmul.f32 %v3661_v29, %v1353_v15  ;;  %v1431_v20 = vmul.f32 %v3661_v29, %v1348_v16  ;;  %v1484_v21 = vpack.c.bf16 %v1462_v11, %v1461_v12  ;;  %v2171_v16 = vlaneseq }
 0x233   : > { %v1464_v22 = vadd.f32 %v1432_v19, %v1201_v13  ;;  %v1463_v23 = vadd.f32 %v1431_v20, %v1200_v14  ;;  %3042 = vmatmul.mubr.bf16.vlgmr.msra.gmra.mrb[0].mxu1 %v1484_v21  ;;  %v3727_v17 = vshrl.u32 %v2171_v16, 7  ;;  %v3731_v19 = vstv %s2710_s25 }
 0x234   : > { %v1363_v26 = vpop.permute.xlu1 %1362  ;;  %v1358_v28 = vpop.permute.xlu0 %1357 }
 0x235   : > { %v1434_v32 = vmul.f32 %v3661_v29, %v1363_v26  ;;  %v1433_v33 = vmul.f32 %v3661_v29, %v1358_v28  ;;  %v1485_v34 = vpack.c.bf16 %v1464_v22, %v1463_v23  ;;  %v2174_v18 = vadd.s32 16, %v3727_v17 }
 0x236   : > { %v2206_v20 = vadd.s32 %v3731_v19, %v3727_v17  ;;  %v2173_v21 = vadd.s32 8, %v3727_v17  ;;  %v2178_v22 = vadd.s32 48, %v3727_v17  ;;  %v2176_v23 = vadd.s32 32, %v3727_v17 }
 0x237   : > { %v1466_v35 = vadd.f32 %v1434_v32, %v1203_v24  ;;  %v1465_v36 = vadd.f32 %v1433_v33, %v1202_v25  ;;  %3045 = vmatprep.mubr.bf16.mxu1 %v1485_v34  ;;  %v2208_v27 = vadd.s32 %v3731_v19, %v2174_v18  ;;  %v2179_v30 = vadd.s32 56, %v3727_v17 }
 0x238   : > { %v1373_v39 = vpop.permute.xlu1 %1372  ;;  %v1368_v40 = vpop.permute.xlu0 %1367  ;;  %vm2238_vm1 = vcmp.lt.s32.totalorder %v2206_v20, 300  ;;  %v2207_v25 = vadd.s32 %v3731_v19, %v2173_v21  ;;  %v2212_v26 = vadd.s32 %v3731_v19, %v2178_v22  ;;  %v2210_v28 = vadd.s32 %v3731_v19, %v2176_v23 }
 0x239   : > { %v1436_v43 = vmul.f32 %v3661_v29, %v1373_v39  ;;  %v1435_v44 = vmul.f32 %v3661_v29, %v1368_v40  ;;  %v1486_v45 = vpack.c.bf16 %v1466_v35, %v1465_v36  ;;  %vm2240_vm0 = vcmp.lt.s32.totalorder %v2208_v27, 300 }
 0x23a   : > { %v2177_v31 = vadd.s32 40, %v3727_v17  ;;  %v2182_v32 = vadd.s32 80, %v3727_v17  ;;  %v2180_v33 = vadd.s32 64, %v3727_v17  ;;  %v2183_v34 = vadd.s32 88, %v3727_v17 }
 0x23b   : > { %v1468_v46 = vadd.f32 %v1436_v43, %v1205_v37  ;;  %v1467_v47 = vadd.f32 %v1435_v44, %v1204_v38  ;;  %3046 = vmatmul.mubr.bf16.gmra.mrb[4].mxu1 %v1486_v45  ;;  %v4263_v35 = vmov 0.0   ;;  %vm2239_vm3 = vcmp.lt.s32.totalorder %v2207_v25, 300 }
 0x23c   : > { %v1383_v50 = vpop.permute.xlu1 %1382  ;;  %v1378_v51 = vpop.permute.xlu0 %1377  ;;  %v3750_v36 = vsel %vm2240_vm0, 1.0, %v4263_v35  ;;  %v3753_v37 = vsel %vm2238_vm1, 1.0, %v4263_v35  ;;  %vm2244_vm4 = vcmp.lt.s32.totalorder %v2212_v26, 300  ;;  %vm2242_vm5 = vcmp.lt.s32.totalorder %v2210_v28, 300 }
 0x23d   : > { %v1438_v54 = vmul.f32 %v3661_v29, %v1383_v50  ;;  %v1437_v55 = vmul.f32 %v3661_v29, %v1378_v51  ;;  %v1487_v56 = vpack.c.bf16 %v1468_v46, %v1467_v47  ;;  %v2213_v38 = vadd.s32 %v3731_v19, %v2179_v30 }
 0x23e   : > { %v2211_v39 = vadd.s32 %v3731_v19, %v2177_v31  ;;  %v2216_v40 = vadd.s32 %v3731_v19, %v2182_v32  ;;  %v2214_v41 = vadd.s32 %v3731_v19, %v2180_v33  ;;  %v2217_v42 = vadd.s32 %v3731_v19, %v2183_v34 }
 0x23f   : > { %v1470_v57 = vadd.f32 %v1438_v54, %v1207_v48  ;;  %v1469_v58 = vadd.f32 %v1437_v55, %v1206_v49  ;;  %3049 = vmatprep.mubr.bf16.mxu1 %v1487_v56  ;;  %v2181_v43 = vadd.s32 72, %v3727_v17  ;;  %v2186_v44 = vadd.s32 112, %v3727_v17 }
 0x240   : > { %v1393_v61 = vpop.permute.xlu1 %1392  ;;  %v1388_v62 = vpop.permute.xlu0 %1387  ;;  %v2184_v45 = vadd.s32 96, %v3727_v17  ;;  %v2187_v46 = vadd.s32 120, %v3727_v17  ;;  %v2185_v47 = vadd.s32 104, %v3727_v17  ;;  %v2190_v48 = vadd.s32 144, %v3727_v17 }
 0x241   : > { %v1440_v1 = vmul.f32 %v3661_v29, %v1393_v61  ;;  %v1439_v2 = vmul.f32 %v3661_v29, %v1388_v62  ;;  %v1488_v3 = vpack.c.bf16 %v1470_v57, %v1469_v58  ;;  %v3770_v50 = vsel %vm2239_vm3, 1.0, %v4263_v35 }
 0x242   : > { %v3773_v51 = vsel %vm2244_vm4, 1.0, %v4263_v35  ;;  %v2188_v52 = vadd.s32 128, %v3727_v17  ;;  %v3778_v53 = vsel %vm2242_vm5, 1.0, %v4263_v35  ;;  %vm2245_vm6 = vcmp.lt.s32.totalorder %v2213_v38, 300 }
 0x243   : > { %v1472_v4 = vadd.f32 %v1440_v1, %v1209_v59  ;;  %v1471_v5 = vadd.f32 %v1439_v2, %v1208_v60  ;;  %3050 = vmatmul.mubr.bf16.gmra.mrb[8].mxu1 %v1488_v3  ;;  %vm2243_vm7 = vcmp.lt.s32.totalorder %v2211_v39, 300  ;;  %vm2248_vm8 = vcmp.lt.s32.totalorder %v2216_v40, 300 }
 0x244   : > { %v1403_v8 = vpop.permute.xlu1 %1402  ;;  %v1398_v9 = vpop.permute.xlu0 %1397  ;;  %vm2246_vm9 = vcmp.lt.s32.totalorder %v2214_v41, 300  ;;  %vm2249_vm10 = vcmp.lt.s32.totalorder %v2217_v42, 300  ;;  %v2215_v54 = vadd.s32 %v3731_v19, %v2181_v43  ;;  %v2220_v55 = vadd.s32 %v3731_v19, %v2186_v44 }
 0x245   : > { %v1442_v10 = vmul.f32 %v3661_v29, %v1403_v8  ;;  %v1441_v11 = vmul.f32 %v3661_v29, %v1398_v9  ;;  %v1489_v12 = vpack.c.bf16 %v1472_v4, %v1471_v5  ;;  %v2175_v29 = vadd.s32 24, %v3727_v17 }
 0x246   : > { %v2218_v56 = vadd.s32 %v3731_v19, %v2184_v45  ;;  %v2221_v57 = vadd.s32 %v3731_v19, %v2187_v46  ;;  %v2219_v58 = vadd.s32 %v3731_v19, %v2185_v47  ;;  %v2224_v59 = vadd.s32 %v3731_v19, %v2190_v48 }
 0x247   : > { %v1474_v13 = vadd.f32 %v1442_v10, %v1211_v6  ;;  %v1473_v14 = vadd.f32 %v1441_v11, %v1210_v7  ;;  %3053 = vmatprep.mubr.bf16.mxu1 %v1489_v12  ;;  %v2209_v24 = vadd.s32 %v3731_v19, %v2175_v29  ;;  %v3787_v60 = vsel %vm2245_vm6, 1.0, %v4263_v35  ;;  %v3809_v6 = vld [vmem:[%s4255_s3] ss:$0 sm:$0xff] }
 0x248   : > { %v2222_v61 = vadd.s32 %v3731_v19, %v2188_v52  ;;  %v2191_v62 = vadd.s32 152, %v3727_v17  ;;  %v2189_v63 = vadd.s32 136, %v3727_v17  ;;  %v3793_v0 = vsel %vm2243_vm7, 1.0, %v4263_v35 }
 0x249   : > { %v1490_v15 = vpack.c.bf16 %v1474_v13, %v1473_v14  ;;  %vm2241_vm2 = vcmp.lt.s32.totalorder %v2209_v24, 300  ;;  %v3796_v1 = vsel %vm2248_vm8, 1.0, %v4263_v35  ;;  %v3799_v2 = vsel %vm2246_vm9, 1.0, %v4263_v35 }
 0x24a   : > { %v3767_v49 = vsel %vm2241_vm2, 1.0, %v4263_v35  ;;  %v2194_v3 = vadd.s32 176, %v3727_v17  ;;  %v3803_v4 = vsel %vm2249_vm10, 1.0, %v4263_v35  ;;  %vm2247_vm11 = vcmp.lt.s32.totalorder %v2215_v54, 300 }
 0x24b   : > { %3054 = vmatmul.mubr.bf16.gmra.mrb[12].mxu1 %v1490_v15  ;;  %vm2252_vm12 = vcmp.lt.s32.totalorder %v2220_v55, 300  ;;  %v2192_v5 = vadd.s32 160, %v3727_v17  ;;  %vm2250_vm13 = vcmp.lt.s32.totalorder %v2218_v56, 300  ;;  %vm2253_vm14 = vcmp.lt.s32.totalorder %v2221_v57, 300 }
 0x24c   : > { %vm2251_vm15 = vcmp.lt.s32.totalorder %v2219_v58, 300  ;;  %vm2256_vm0 = vcmp.lt.s32.totalorder %v2224_v59, 300  ;;  %vm2254_vm1 = vcmp.lt.s32.totalorder %v2222_v61, 300  ;;  %v2225_v7 = vadd.s32 %v3731_v19, %v2191_v62 }
 0x24d   : > { %v2223_v8 = vadd.s32 %v3731_v19, %v2189_v63  ;;  %v2195_v9 = vadd.s32 184, %v3727_v17  ;;  %v3815_v10 = vsel %vm2247_vm11, 1.0, %v4263_v35  ;;  %v3818_v11 = vsel %vm2252_vm12, 1.0, %v4263_v35 }
 0x24e   : > { %v2228_v12 = vadd.s32 %v3731_v19, %v2194_v3  ;;  %v2193_v13 = vadd.s32 168, %v3727_v17  ;;  %v3823_v15 = vsel %vm2250_vm13, 1.0, %v4263_v35  ;;  %v3826_v16 = vsel %vm2253_vm14, 1.0, %v4263_v35 }
 0x24f   : > { %v2226_v18 = vadd.s32 %v3731_v19, %v2192_v5  ;;  %v2198_v27 = vadd.s32 208, %v3727_v17  ;;  %v3835_v21 = vsel %vm2251_vm15, 1.0, %v4263_v35  ;;  %v3839_v22 = vsel %vm2256_vm0, 1.0, %v4263_v35 }
 0x250   : > { %v3843_v23 = vsel %vm2254_vm1, 1.0, %v4263_v35  ;;  %vm2257_vm2 = vcmp.lt.s32.totalorder %v2225_v7, 300  ;;  %vm2255_vm3 = vcmp.lt.s32.totalorder %v2223_v8, 300  ;;  %v2229_v26 = vadd.s32 %v3731_v19, %v2195_v9 }
 0x251   : > { %vm2260_vm4 = vcmp.lt.s32.totalorder %v2228_v12, 300  ;;  %v2227_v32 = vadd.s32 %v3731_v19, %v2193_v13  ;;  %vm2258_vm5 = vcmp.lt.s32.totalorder %v2226_v18, 300  ;;  %v2232_v38 = vadd.s32 %v3731_v19, %v2198_v27 }
 0x252   : > { %v3862_v41 = vsel %vm2257_vm2, 1.0, %v4263_v35  ;;  %v3865_v42 = vsel %vm2255_vm3, 1.0, %v4263_v35  ;;  %v3870_v45 = vsel %vm2260_vm4, 1.0, %v4263_v35  ;;  %vm2261_vm6 = vcmp.lt.s32.totalorder %v2229_v26, 300 }
 0x253   : > { %4269 = vst [vmem:[#allocation6_spill] sm:$0xff] %v3870_v45  ;;  %v3875_v48 = vsel %vm2258_vm5, 1.0, %v4263_v35  ;;  %vm2259_vm7 = vcmp.lt.s32.totalorder %v2227_v32, 300  ;;  %vm2264_vm8 = vcmp.lt.s32.totalorder %v2232_v38, 300  ;;  %v2196_v56 = vadd.s32 192, %v3727_v17 }
 0x254   : > { %v3884_v62 = vsel %vm2261_vm6, 1.0, %v4263_v35  ;;  %v3890_v8 = vsel %vm2259_vm7, 1.0, %v4263_v35  ;;  %v3895_v18 = vsel %vm2264_vm8, 1.0, %v4263_v35  ;;  %vm2472_vm0 = vcmask 1040384  }
 0x255   : > { %4270 = vst [vmem:[#allocation7_spill] sm:$0xff] %v3884_v62  ;;  %4271 = vst [vmem:[#allocation8_spill] sm:$0xff] %v3890_v8  ;;  %v3899_v26 = vadd.s32 %v3731_v19, %v2196_v56  ;;  %vm2474_vm1 = vcmask 1041408  }
 0x256   : > { %4272 = vst [vmem:[#allocation9_spill] sm:$0xff] %v3895_v18 }
 0x257   : > { %vm2262_vm9 = vcmp.lt.s32.totalorder %v3899_v26, 300 }
 0x2e7   : > { %v3027_v14 = vpop.f32.mrb[0].mxu0 }
 0x2e8   : > { %v3831_v20 = vadd.f32 %v3027_v14, %v3809_v6  ;;  %v1596_v29 = vpop.f32.mrb[1].mxu0 }
 0x2e9   : > { %v3846_v24 = vadd.f32 %v3809_v6, %v1596_v29  ;;  %v3028_v25 = vpop.f32.mrb[2].mxu0 }
 0x2ea   : > { %v1757_v28 = vmul.f32 0.044715, %v3831_v20  ;;  %v3851_v30 = vadd.f32 %v3028_v25, %v3809_v6  ;;  %v1599_v31 = vpop.f32.mrb[3].mxu0 }
 0x2eb   : > { %v1755_v33 = vmul.f32 0.044715, %v3846_v24  ;;  %v3856_v34 = vadd.f32 %v3809_v6, %v1599_v31 }
 0x2ec   : > { %v1789_v39 = vmul.f32 %v1757_v28, %v3831_v20  ;;  %v1758_v40 = vmul.f32 0.044715, %v3851_v30 }
 0x2ed   : > { %v1787_v43 = vmul.f32 %v1755_v33, %v3846_v24  ;;  %v1756_v44 = vmul.f32 0.044715, %v3856_v34 }
 0x2ee   : > { %v1821_v46 = vmul.f32 %v1789_v39, %v3831_v20  ;;  %v1790_v47 = vmul.f32 %v1758_v40, %v3851_v30 }
 0x2ef   : > { %v1819_v52 = vmul.f32 %v1787_v43, %v3846_v24  ;;  %v1788_v54 = vmul.f32 %v1756_v44, %v3856_v34  ;;  %v3031_v55 = vpop.f32.mrb[4].mxu0  ;;  %v3906_v44 = vadd.s32 216, %v3727_v17 }
 0x2f0   : > { %v1853_v57 = vadd.f32 %v1821_v46, %v3831_v20  ;;  %v1822_v58 = vmul.f32 %v1790_v47, %v3851_v30  ;;  %v1621_v59 = vadd.f32 %v3031_v55, %v3809_v6  ;;  %v1612_v61 = vpop.f32.mrb[5].mxu0  ;;  %v1725_v46 = vmul.f32 0.5, %v3831_v20 }
 0x2f1   : > { %v1851_v63 = vadd.f32 %v1819_v52, %v3846_v24  ;;  %v1820_v3 = vmul.f32 %v1788_v54, %v3856_v34  ;;  %v1613_v5 = vadd.f32 %v3809_v6, %v1612_v61  ;;  %v3032_v7 = vpop.f32.mrb[6].mxu0  ;;  %v1723_v55 = vmul.f32 0.5, %v3846_v24 }
 0x2f2   : > { %v1885_v9 = vmul.f32 0.7978846, %v1853_v57  ;;  %v1854_v12 = vadd.f32 %v1822_v58, %v3851_v30  ;;  %v1761_v13 = vmul.f32 0.044715, %v1621_v59  ;;  %v1615_v14 = vpop.f32.mrb[7].mxu0  ;;  %v1624_v32 = vadd.f32 %v3032_v7, %v3809_v6 }
 0x2f3   : > { %v1883_v27 = vmul.f32 0.7978846, %v1851_v63  ;;  %v1852_v29 = vadd.f32 %v1820_v3, %v3856_v34  ;;  %v1759_v25 = vmul.f32 0.044715, %v1613_v5  ;;  %v3903_v40 = vadd.f32 %v3809_v6, %v1615_v14 }
 0x2f4   : > { %3222 = vtanh.f32 %v1885_v9  ;;  %v1886_v28 = vmul.f32 0.7978846, %v1854_v12  ;;  %v1793_v31 = vmul.f32 %v1761_v13, %v1621_v59  ;;  %v1762_v43 = vmul.f32 0.044715, %v1624_v32 }
 0x2f5   : > { %3224 = vtanh.f32 %v1883_v27  ;;  %v1884_v33 = vmul.f32 0.7978846, %v1852_v29  ;;  %v1791_v39 = vmul.f32 %v1759_v25, %v1613_v5  ;;  %v1760_v52 = vmul.f32 0.044715, %v3903_v40 }
 0x2f6   : > { %3226 = vtanh.f32 %v1886_v28  ;;  %v1825_v38 = vmul.f32 %v1793_v31, %v1621_v59  ;;  %v1794_v57 = vmul.f32 %v1762_v43, %v1624_v32  ;;  %v1726_v63 = vmul.f32 0.5, %v3851_v30 }
 0x2f7   : > { %3228 = vtanh.f32 %v1884_v33  ;;  %v1823_v47 = vmul.f32 %v1791_v39, %v1613_v5  ;;  %v3035_v54 = vpop.f32.mrb[8].mxu0  ;;  %v1792_v7 = vmul.f32 %v1760_v52, %v3903_v40  ;;  %v1724_v12 = vmul.f32 0.5, %v3856_v34 }
 0x2f8   : > { %v1857_v56 = vadd.f32 %v1825_v38, %v1621_v59  ;;  %v1637_v58 = vadd.f32 %v3035_v54, %v3809_v6  ;;  %v1628_v61 = vpop.f32.mrb[9].mxu0  ;;  %v1826_v14 = vmul.f32 %v1794_v57, %v1624_v32  ;;  %v3918_v29 = vmul.f32 0.5, %v1621_v59 }
 0x2f9   : > { %v1855_v3 = vadd.f32 %v1823_v47, %v1613_v5  ;;  %v3915_v9 = vadd.f32 %v3809_v6, %v1628_v61  ;;  %v3036_v20 = vpop.f32.mrb[10].mxu0  ;;  %v1824_v28 = vmul.f32 %v1792_v7, %v3903_v40  ;;  %v3925_v38 = vmul.f32 0.5, %v1613_v5 }
 0x2fa   : > { %v1889_v13 = vmul.f32 0.7978846, %v1857_v56  ;;  %v1765_v27 = vmul.f32 0.044715, %v1637_v58  ;;  %v1631_v24 = vpop.f32.mrb[11].mxu0  ;;  %v1858_v31 = vadd.f32 %v1826_v14, %v1624_v32  ;;  %v3923_v39 = vadd.f32 %v3036_v20, %v3809_v6 }
 0x2fb   : > { %v1887_v25 = vmul.f32 0.7978846, %v1855_v3  ;;  %v1763_v30 = vmul.f32 0.044715, %v3915_v9  ;;  %v1856_v34 = vadd.f32 %v1824_v28, %v3903_v40  ;;  %v3929_v47 = vmul.f32 0.5, %v1624_v32 }
 0x2fc   : > { %3230 = vtanh.f32 %v1889_v13  ;;  %v1797_v33 = vmul.f32 %v1765_v27, %v1637_v58  ;;  %v1890_v52 = vmul.f32 0.7978846, %v1858_v31  ;;  %v1766_v56 = vmul.f32 0.044715, %v3923_v39 }
 0x2fd   : > { %3232 = vtanh.f32 %v1887_v25  ;;  %v1795_v43 = vmul.f32 %v1763_v30, %v3915_v9  ;;  %v1888_v3 = vmul.f32 0.7978846, %v1856_v34  ;;  %v3934_v5 = vadd.f32 %v3809_v6, %v1631_v24 }
 0x2fe   : > { %v3223_v59 = vpop.eup %3222  ;;  %v1829_v54 = vmul.f32 %v1797_v33, %v1637_v58  ;;  %3234 = vtanh.f32 %v1890_v52  ;;  %v1798_v32 = vmul.f32 %v1766_v56, %v3923_v39 }
 0x2ff   : > { %v3225_v57 = vpop.eup %3224  ;;  %v1949_v61 = vadd.f32 1.0, %v3223_v59  ;;  %v1827_v7 = vmul.f32 %v1795_v43, %v3915_v9  ;;  %v3039_v20 = vpop.f32.mrb[12].mxu0  ;;  %3236 = vtanh.f32 %v1888_v3  ;;  %v1764_v18 = vmul.f32 0.044715, %v3934_v5 }
 0x300   : > { %v3227_v13 = vpop.eup %3226  ;;  %v1947_v14 = vadd.f32 1.0, %v3225_v57  ;;  %v1861_v27 = vadd.f32 %v1829_v54, %v1637_v58  ;;  %v3937_v25 = vpop.f32.mrb[13].mxu0  ;;  %v1830_v35 = vmul.f32 %v1798_v32, %v3923_v39  ;;  %v1728_v54 = vmul.f32 0.5, %v3903_v40 }
 0x301   : > { %v3229_v28 = vpop.eup %3228  ;;  %v1981_v30 = vmul.f32 %v1949_v61, %v1725_v46  ;;  %v1950_v31 = vadd.f32 1.0, %v3227_v13  ;;  %v1859_v33 = vadd.f32 %v1827_v7, %v3915_v9  ;;  %v3940_v34 = vpop.f32.mrb[14].mxu0  ;;  %v3950_v13 = vmul.f32 0.5, %v1637_v58 }
 0x302   : > { %v1979_v43 = vmul.f32 %v1947_v14, %v1723_v55  ;;  %v1948_v24 = vadd.f32 1.0, %v3229_v28  ;;  %v1893_v59 = vmul.f32 0.7978846, %v1861_v27  ;;  %v3943_v57 = vpop.f32.mrb[15].mxu0  ;;  %v1862_v3 = vadd.f32 %v1830_v35, %v3923_v39 }
 0x303   : > { %v1982_v52 = vmul.f32 %v1950_v31, %v1726_v63  ;;  %v1891_v56 = vmul.f32 0.7978846, %v1859_v33  ;;  %v2336_v55 = vmul.f32 %v3750_v36, %v1981_v30  ;;  %v1796_v36 = vmul.f32 %v1764_v18, %v3934_v5 }
 0x304   : > { %v2334_v46 = vmul.f32 %v3753_v37, %v1979_v43  ;;  %v1980_v61 = vmul.f32 %v1948_v24, %v1724_v12  ;;  %3238 = vtanh.f32 %v1893_v59  ;;  %v1894_v32 = vmul.f32 0.7978846, %v1862_v3 }
 0x305   : > { %v2786_v7 = vpack.c.bf16 %v1982_v52, %v1981_v30  ;;  %3240 = vtanh.f32 %v1891_v56  ;;  %v2337_v40 = vmul.f32 %v3767_v49, %v1982_v52  ;;  %v3959_v31 = vadd.f32 %v3039_v20, %v3809_v6 }
 0x306   : > { %v3231_v63 = vpop.eup %3230  ;;  %v2781_v14 = vpack.c.bf16 %v1980_v61, %v1979_v43  ;;  %v2335_v27 = vmul.f32 %v3770_v50, %v1980_v61  ;;  %v3954_v37 = vpop.f32.mrb[0].mxu1  ;;  %v2403_v28 = vmul.f32 %v2334_v46, %v1979_v43  ;;  %3242 = vtanh.f32 %v1894_v32 }
 0x307   : > { %v3233_v12 = vpop.eup %3232  ;;  %2858 = vst [vmem:[%s3532_s15 + $0x8] sm:$0xff] %v2786_v7   ;;  %v1953_v35 = vadd.f32 1.0, %v3231_v63  ;;  %v3961_v58 = vpop.f32.mrb[1].mxu1  ;;  %v2405_v59 = vmul.f32 %v2336_v55, %v1981_v30  ;;  %v1731_v56 = vmul.f32 0.5, %v3915_v9  ;;  %v1828_v43 = vmul.f32 %v1796_v36, %v3934_v5 }
 0x308   : > { %2782 = vst [vmem:[%s3532_s15] sm:$0xff] %v2781_v14   ;;  %v2366_v33 = vadd.f32 %v2335_v27, %v2334_v46  ;;  %v2404_v49 = vmul.f32 %v2335_v27, %v1980_v61  ;;  %v1951_v24 = vadd.f32 1.0, %v3233_v12  ;;  %v3964_v50 = vpop.f32.mrb[2].mxu1  ;;  %v1769_v3 = vmul.f32 0.044715, %v3959_v31  ;;  %v3235_v20 = vpop.eup %3234 }
 0x309   : > { %v3969_v18 = vpop.f32.mrb[3].mxu1  ;;  %v2406_v7 = vmul.f32 %v2337_v40, %v1982_v52  ;;  %v3237_v61 = vpop.eup %3236  ;;  %v1985_v14 = vmul.f32 %v1953_v35, %v3918_v29  ;;  %v1954_v27 = vadd.f32 1.0, %v3235_v20  ;;  %v1860_v30 = vadd.f32 %v1828_v43, %v3934_v5 }
 0x30a   : > { %v2367_v63 = vadd.f32 %v2366_v33, %v2336_v55  ;;  %v2435_v62 = vadd.f32 %v2404_v49, %v2403_v28  ;;  %v1983_v46 = vmul.f32 %v1951_v24, %v3925_v38  ;;  %v1801_v9 = vmul.f32 %v1769_v3, %v3959_v31 }
 0x30b   : > { %v1952_v8 = vadd.f32 1.0, %v3237_v61  ;;  %v1986_v45 = vmul.f32 %v1954_v27, %v3929_v47  ;;  %v1892_v52 = vmul.f32 0.7978846, %v1860_v30  ;;  %v3980_v38 = vadd.f32 %v3809_v6, %v3937_v25 }
 0x30c   : > { %v2436_v32 = vadd.f32 %v2435_v62, %v2405_v59  ;;  %v2338_v12 = vmul.f32 %v3778_v53, %v1983_v46  ;;  %v2368_v36 = vadd.f32 %v2367_v63, %v2337_v40  ;;  %v1833_v55 = vmul.f32 %v1801_v9, %v3959_v31 }
 0x30d   : > { %v1984_v49 = vmul.f32 %v1952_v8, %v1728_v54  ;;  %v2340_v40 = vmul.f32 %v3773_v51, %v1985_v14  ;;  %v2796_v24 = vpack.c.bf16 %v1986_v45, %v1985_v14  ;;  %3244 = vtanh.f32 %v1892_v52 }
 0x30e   : > { %v3239_v29 = vpop.eup %3238  ;;  %v2369_v28 = vadd.f32 %v2368_v36, %v2338_v12  ;;  %v2407_v35 = vmul.f32 %v2338_v12, %v1983_v46  ;;  %v2437_v33 = vadd.f32 %v2436_v32, %v2406_v7  ;;  %v3982_v62 = vpop.f32.mrb[4].mxu1  ;;  %v2341_v8 = vmul.f32 %v3787_v60, %v1986_v45 }
 0x30f   : > { %v3241_v53 = vpop.eup %3240  ;;  %v1957_v47 = vadd.f32 1.0, %v3239_v29  ;;  %v3985_v59 = vpop.f32.mrb[5].mxu1  ;;  %v2791_v25 = vpack.c.bf16 %v1984_v49, %v1983_v46  ;;  %v2339_v3 = vmul.f32 %v3793_v0, %v1984_v49  ;;  %2860 = vst [vmem:[%s3532_s15 + $0x18] sm:$0xff] %v2796_v24   ;;  %v1734_v51 = vmul.f32 0.5, %v3923_v39 }
 0x310   : > { %v2438_v43 = vadd.f32 %v2437_v33, %v2407_v35  ;;  %v1955_v20 = vadd.f32 1.0, %v3241_v53  ;;  %v3988_v63 = vpop.f32.mrb[6].mxu1  ;;  %v1865_v7 = vadd.f32 %v1833_v55, %v3959_v31  ;;  %v3243_v27 = vpop.eup %3242  ;;  %v1767_v0 = vmul.f32 0.044715, %v3980_v38 }
 0x311   : > { %v1989_v54 = vmul.f32 %v1957_v47, %v3950_v13  ;;  %v3995_v61 = vpop.f32.mrb[7].mxu1  ;;  %2859 = vst [vmem:[%s3532_s15 + $0x10] sm:$0xff] %v2791_v25   ;;  %v2370_v30 = vadd.f32 %v2369_v28, %v2339_v3  ;;  %v2408_v46 = vmul.f32 %v2339_v3, %v1984_v49  ;;  %v2409_v32 = vmul.f32 %v2340_v40, %v1985_v14 }
 0x312   : > { %v1987_v9 = vmul.f32 %v1955_v20, %v1731_v56  ;;  %v1958_v12 = vadd.f32 1.0, %v3243_v27  ;;  %v1897_v36 = vmul.f32 0.7978846, %v1865_v7  ;;  %v1656_v60 = vadd.f32 %v3940_v34, %v3809_v6 }
 0x313   : > { %v2371_v13 = vadd.f32 %v2370_v30, %v2340_v40  ;;  %v2439_v52 = vadd.f32 %v2438_v43, %v2408_v46  ;;  %v1799_v55 = vmul.f32 %v1767_v0, %v3980_v38  ;;  %v2410_v29 = vmul.f32 %v2341_v8, %v1986_v45 }
 0x314   : > { %v2342_v39 = vmul.f32 %v3799_v2, %v1987_v9  ;;  %v4004_v35 = vmul.f32 %v3796_v1, %v1989_v54  ;;  %v1990_v28 = vmul.f32 %v1958_v12, %v1734_v51  ;;  %v4007_v56 = vadd.s32 200, %v3727_v17 }
 0x315   : > { %v2440_v14 = vadd.f32 %v2439_v52, %v2409_v32  ;;  %v2372_v33 = vadd.f32 %v2371_v13, %v2341_v8  ;;  %v1831_v34 = vmul.f32 %v1799_v55, %v3980_v38  ;;  %3246 = vtanh.f32 %v1897_v36 }
 0x316   : > { %v2411_v49 = vmul.f32 %v2342_v39, %v1987_v9  ;;  %v4010_v53 = vpop.f32.mrb[8].mxu1  ;;  %v2806_v40 = vpack.c.bf16 %v1990_v28, %v1989_v54  ;;  %v1770_v2 = vmul.f32 0.044715, %v1656_v60  ;;  %v1648_v45 = vadd.f32 %v3809_v6, %v3943_v57 }
 0x317   : > { %v4014_v1 = vpop.f32.mrb[9].mxu1  ;;  %v2373_v24 = vadd.f32 %v2372_v33, %v2342_v39  ;;  %v2441_v47 = vadd.f32 %v2440_v14, %v2410_v29  ;;  %v1863_v43 = vadd.f32 %v1831_v34, %v3980_v38  ;;  %v4019_v25 = vadd.f32 %v3954_v37, %v3809_v6  ;;  %v3245_v20 = vpop.eup %3244 }
 0x318   : > { %v4021_v3 = vpop.f32.mrb[10].mxu1  ;;  %2862 = vst [vmem:[%s3532_s15 + $0x28] sm:$0xff] %v2806_v40   ;;  %v1732_v8 = vmul.f32 0.5, %v3934_v5  ;;  %v4026_v51 = vmul.f32 0.5, %v3959_v31  ;;  %v1802_v57 = vmul.f32 %v1770_v2, %v1656_v60  ;;  %v1768_v7 = vmul.f32 0.044715, %v1648_v45 }
 0x319   : > { %v4028_v27 = vpop.f32.mrb[11].mxu1  ;;  %v2442_v30 = vadd.f32 %v2441_v47, %v2411_v49  ;;  %v1956_v46 = vadd.f32 1.0, %v3245_v20  ;;  %v4031_v0 = vmul.f32 0.5, %v3980_v38  ;;  %v1895_v37 = vmul.f32 0.7978846, %v1863_v43 }
 0x31a   : > { %v1834_v32 = vmul.f32 %v1802_v57, %v1656_v60  ;;  %v1800_v12 = vmul.f32 %v1768_v7, %v1648_v45  ;;  %v1773_v36 = vmul.f32 0.044715, %v4019_v25  ;;  %v1661_v5 = vadd.f32 %v3809_v6, %v3961_v58 }
 0x31b   : > { %v2413_v31 = vmul.f32 %v4004_v35, %v1989_v54  ;;  %v1988_v13 = vmul.f32 %v1956_v46, %v1732_v8  ;;  %3248 = vtanh.f32 %v1895_v37  ;;  %v1672_v52 = vadd.f32 %v3964_v50, %v3809_v6 }
 0x31c   : > { %v4039_v39 = vmul.f32 0.5, %v1656_v60  ;;  %v1866_v38 = vadd.f32 %v1834_v32, %v1656_v60  ;;  %v1832_v55 = vmul.f32 %v1800_v12, %v1648_v45  ;;  %v1805_v29 = vmul.f32 %v1773_v36, %v4019_v25 }
 0x31d   : > { %v2345_v14 = vmul.f32 %v3803_v4, %v1990_v28  ;;  %v2801_v33 = vpack.c.bf16 %v1988_v13, %v1987_v9  ;;  %v2343_v49 = vmul.f32 %v3815_v10, %v1988_v13  ;;  %v1771_v58 = vmul.f32 0.044715, %v1661_v5 }
 0x31e   : > { %v4044_v34 = vpop.f32.mrb[12].mxu1  ;;  %v1898_v54 = vmul.f32 0.7978846, %v1866_v38  ;;  %v1864_v40 = vadd.f32 %v1832_v55, %v1648_v45  ;;  %v1837_v2 = vmul.f32 %v1805_v29, %v4019_v25  ;;  %v1774_v47 = vmul.f32 0.044715, %v1672_v52 }
 0x31f   : > { %v4047_v50 = vpop.f32.mrb[13].mxu1  ;;  %2861 = vst [vmem:[%s3532_s15 + $0x20] sm:$0xff] %v2801_v33   ;;  %v2374_v60 = vadd.f32 %v2373_v24, %v2343_v49  ;;  %v2412_v43 = vmul.f32 %v2343_v49, %v1988_v13  ;;  %v1803_v20 = vmul.f32 %v1771_v58, %v1661_v5  ;;  %v1664_v4 = vadd.f32 %v3809_v6, %v3969_v18  ;;  %v3247_v10 = vpop.eup %3246 }
 0x320   : > { %v4052_v9 = vpop.f32.mrb[14].mxu1  ;;  %3250 = vtanh.f32 %v1898_v54  ;;  %v1896_v8 = vmul.f32 0.7978846, %v1864_v40  ;;  %v1869_v57 = vadd.f32 %v1837_v2, %v4019_v25  ;;  %v1806_v7 = vmul.f32 %v1774_v47, %v1672_v52 }
 0x321   : > { %v4055_v46 = vpop.f32.mrb[15].mxu1  ;;  %v2414_v37 = vmul.f32 %v2345_v14, %v1990_v28  ;;  %v2375_v32 = vadd.f32 %v2374_v60, %v4004_v35  ;;  %v2443_v12 = vadd.f32 %v2442_v30, %v2412_v43  ;;  %v1835_v24 = vmul.f32 %v1803_v20, %v1661_v5 }
 0x322   : > { %v1736_v36 = vmul.f32 0.5, %v1648_v45  ;;  %3252 = vtanh.f32 %v1896_v8  ;;  %v1901_v13 = vmul.f32 0.7978846, %v1869_v57  ;;  %v1838_v38 = vmul.f32 %v1806_v7, %v1672_v52 }
 0x323   : > { %v2444_v18 = vadd.f32 %v2443_v12, %v2413_v31  ;;  %v1961_v55 = vadd.f32 1.0, %v3247_v10  ;;  %v2376_v29 = vadd.f32 %v2375_v32, %v2345_v14  ;;  %v1867_v33 = vadd.f32 %v1835_v24, %v1661_v5 }
 0x324   : > { %3254 = vtanh.f32 %v1901_v13  ;;  %v1870_v49 = vadd.f32 %v1838_v38, %v1672_v52  ;;  %v1772_v58 = vmul.f32 0.044715, %v1664_v4  ;;  %v4060_v54 = vadd.f32 %v3982_v62, %v3809_v6 }
 0x325   : > { %v3249_v28 = vpop.eup %3248  ;;  %v2445_v40 = vadd.f32 %v2444_v18, %v2414_v37  ;;  %v4063_v35 = vmul.f32 0.5, %v4019_v25  ;;  %v1899_v45 = vmul.f32 0.7978846, %v1867_v33  ;;  %v4067_v30 = vadd.f32 %v3809_v6, %v3985_v59 }
 0x326   : > { %v1959_v31 = vadd.f32 1.0, %v3249_v28  ;;  %v1739_v14 = vmul.f32 0.5, %v1661_v5  ;;  %v1902_v2 = vmul.f32 0.7978846, %v1870_v49  ;;  %v1804_v47 = vmul.f32 %v1772_v58, %v1664_v4 }
 0x327   : > { %v1993_v60 = vmul.f32 %v1961_v55, %v4026_v51  ;;  %3256 = vtanh.f32 %v1899_v45  ;;  %v1777_v62 = vmul.f32 0.044715, %v4060_v54  ;;  %v1775_v43 = vmul.f32 0.044715, %v4067_v30 }
 0x328   : > { %v1991_v20 = vmul.f32 %v1959_v31, %v4031_v0  ;;  %3258 = vtanh.f32 %v1902_v2  ;;  %v1836_v25 = vmul.f32 %v1804_v47, %v1664_v4  ;;  %v4075_v10 = vadd.f32 %v3988_v63, %v3809_v6 }
 0x329   : > { %v1742_v59 = vmul.f32 0.5, %v1672_v52  ;;  %v4077_v8 = vmul.f32 0.5, %v1664_v4  ;;  %v1809_v5 = vmul.f32 %v1777_v62, %v4060_v54  ;;  %v1807_v51 = vmul.f32 %v1775_v43, %v4067_v30 }
 0x32a   : > { %v3251_v57 = vpop.eup %3250  ;;  %v2346_v7 = vmul.f32 %v3823_v15, %v1991_v20  ;;  %v1868_v37 = vadd.f32 %v1836_v25, %v1664_v4  ;;  %v1778_v32 = vmul.f32 0.044715, %v4075_v10  ;;  %v4085_v0 = vadd.f32 %v3809_v6, %v3995_v61 }
 0x32b   : > { %v2348_v63 = vmul.f32 %v3818_v11, %v1993_v60  ;;  %v1962_v12 = vadd.f32 1.0, %v3251_v57  ;;  %v1841_v52 = vmul.f32 %v1809_v5, %v4060_v54  ;;  %v1839_v24 = vmul.f32 %v1807_v51, %v4067_v30 }
 0x32c   : > { %v3253_v13 = vpop.eup %3252  ;;  %v2377_v38 = vadd.f32 %v2376_v29, %v2346_v7  ;;  %v2415_v18 = vmul.f32 %v2346_v7, %v1991_v20  ;;  %v1900_v55 = vmul.f32 0.7978846, %v1868_v37  ;;  %v1810_v15 = vmul.f32 %v1778_v32, %v4075_v10 }
 0x32d   : > { %v1994_v4 = vmul.f32 %v1962_v12, %v4039_v39  ;;  %v1960_v33 = vadd.f32 1.0, %v3253_v13  ;;  %v1873_v49 = vadd.f32 %v1841_v52, %v4060_v54  ;;  %v1871_v61 = vadd.f32 %v1839_v24, %v4067_v30 }
 0x32e   : > { %v3255_v11 = vpop.eup %3254  ;;  %v2446_v58 = vadd.f32 %v2445_v40, %v2415_v18  ;;  %3260 = vtanh.f32 %v1900_v55  ;;  %v1842_v28 = vmul.f32 %v1810_v15, %v4075_v10  ;;  %v1776_v45 = vmul.f32 0.044715, %v4085_v0 }
 0x32f   : > { %v2417_v29 = vmul.f32 %v2348_v63, %v1993_v60  ;;  %v2816_v31 = vpack.c.bf16 %v1994_v4, %v1993_v60  ;;  %v1992_v2 = vmul.f32 %v1960_v33, %v1736_v36  ;;  %v1965_v47 = vadd.f32 1.0, %v3255_v11 }
 0x330   : > { %v1905_v62 = vmul.f32 0.7978846, %v1873_v49  ;;  %v1903_v39 = vmul.f32 0.7978846, %v1871_v61  ;;  %v1874_v43 = vadd.f32 %v1842_v28, %v4075_v10  ;;  %v1808_v25 = vmul.f32 %v1776_v45, %v4085_v0 }
 0x331   : > { %v3257_v5 = vpop.eup %3256  ;;  %2864 = vst [vmem:[%s3532_s15 + $0x38] sm:$0xff] %v2816_v31   ;;  %v2349_v40 = vmul.f32 %v3826_v16, %v1994_v4  ;;  %v2811_v51 = vpack.c.bf16 %v1992_v2, %v1991_v20  ;;  %v2347_v57 = vmul.f32 %v3835_v21, %v1992_v2  ;;  %v4103_v7 = vadd.f32 %v4010_v53, %v3809_v6 }
 0x332   : > { %v3259_v36 = vpop.eup %3258  ;;  %v1963_v60 = vadd.f32 1.0, %v3257_v5  ;;  %3262 = vtanh.f32 %v1905_v62  ;;  %v1906_v37 = vmul.f32 0.7978846, %v1874_v43  ;;  %v1840_v32 = vmul.f32 %v1808_v25, %v4085_v0 }
 0x333   : > { %2863 = vst [vmem:[%s3532_s15 + $0x30] sm:$0xff] %v2811_v51   ;;  %v2378_v12 = vadd.f32 %v2377_v38, %v2347_v57  ;;  %v2416_v52 = vmul.f32 %v2347_v57, %v1992_v2  ;;  %v1997_v24 = vmul.f32 %v1965_v47, %v4063_v35  ;;  %v1966_v13 = vadd.f32 1.0, %v3259_v36 }
 0x334   : > { %v1995_v16 = vmul.f32 %v1963_v60, %v1739_v14  ;;  %v4109_v20 = vmul.f32 0.5, %v4060_v54  ;;  %3264 = vtanh.f32 %v1903_v39  ;;  %v1872_v21 = vadd.f32 %v1840_v32, %v4085_v0 }
 0x335   : > { %v2418_v53 = vmul.f32 %v2349_v40, %v1994_v4  ;;  %v2379_v18 = vadd.f32 %v2378_v12, %v2348_v63  ;;  %v2447_v55 = vadd.f32 %v2446_v58, %v2416_v52  ;;  %v1998_v15 = vmul.f32 %v1966_v13, %v1742_v59 }
 0x336   : > { %v2350_v33 = vmul.f32 %v3843_v23, %v1995_v16  ;;  %3266 = vtanh.f32 %v1906_v37  ;;  %v1904_v38 = vmul.f32 0.7978846, %v1872_v21  ;;  %v1781_v49 = vmul.f32 0.044715, %v4103_v7 }
 0x337   : > { %v2448_v35 = vadd.f32 %v2447_v55, %v2417_v29  ;;  %v2352_v14 = vmul.f32 %v3839_v22, %v1997_v24  ;;  %v2380_v61 = vadd.f32 %v2379_v18, %v2349_v40  ;;  %v2826_v54 = vpack.c.bf16 %v1998_v15, %v1997_v24 }
 0x338   : > { %v3261_v11 = vpop.eup %3260  ;;  %v2419_v28 = vmul.f32 %v2350_v33, %v1995_v16  ;;  %3268 = vtanh.f32 %v1904_v38  ;;  %v1813_v4 = vmul.f32 %v1781_v49, %v4103_v7  ;;  %v4118_v59 = vadd.f32 %v3809_v6, %v4014_v1 }
 0x339   : > { %v2381_v63 = vadd.f32 %v2380_v61, %v2350_v33  ;;  %v2449_v23 = vadd.f32 %v2448_v35, %v2418_v53  ;;  %2866 = vst [vmem:[%s3532_s15 + $0x48] sm:$0xff] %v2826_v54   ;;  %v2353_v58 = vmul.f32 %v3862_v41, %v1998_v15  ;;  %v1964_v45 = vadd.f32 1.0, %v3261_v11 }
 0x33a   : > { %v1743_v29 = vmul.f32 0.5, %v4067_v30  ;;  %v1845_v22 = vmul.f32 %v1813_v4, %v4103_v7  ;;  %v1779_v31 = vmul.f32 0.044715, %v4118_v59  ;;  %v4127_v2 = vadd.f32 %v4021_v3, %v3809_v6 }
 0x33b   : > { %v2450_v47 = vadd.f32 %v2449_v23, %v2419_v28  ;;  %v1996_v1 = vmul.f32 %v1964_v45, %v4077_v8  ;;  %v1746_v62 = vmul.f32 0.5, %v4075_v10  ;;  %v4133_v41 = vadd.f32 %v3809_v6, %v4028_v27 }
 0x33c   : > { %v3263_v39 = vpop.eup %3262  ;;  %v1744_v30 = vmul.f32 0.5, %v4085_v0  ;;  %v1877_v43 = vadd.f32 %v1845_v22, %v4103_v7  ;;  %v1811_v25 = vmul.f32 %v1779_v31, %v4118_v59  ;;  %v1782_v3 = vmul.f32 0.044715, %v4127_v2 }
 0x33d   : > { %v2421_v5 = vmul.f32 %v2352_v14, %v1997_v24  ;;  %v2422_v40 = vmul.f32 %v2353_v58, %v1998_v15  ;;  %v2821_v51 = vpack.c.bf16 %v1996_v1, %v1995_v16  ;;  %v2351_v8 = vmul.f32 %v3865_v42, %v1996_v1 }
 0x33e   : > { %v3265_v10 = vpop.eup %3264  ;;  %v1909_v57 = vmul.f32 0.7978846, %v1877_v43  ;;  %v1843_v36 = vmul.f32 %v1811_v25, %v4118_v59  ;;  %v1814_v27 = vmul.f32 %v1782_v3, %v4127_v2  ;;  %v1780_v60 = vmul.f32 0.044715, %v4133_v41  ;;  %v4274_v43 = vld [vmem:[#allocation8_spill] sm:$0xff] }
 0x33f   : > { %2865 = vst [vmem:[%s3532_s15 + $0x40] sm:$0xff] %v2821_v51   ;;  %v2382_v0 = vadd.f32 %v2381_v63, %v2351_v8  ;;  %v2420_v37 = vmul.f32 %v2351_v8, %v1996_v1  ;;  %v1969_v32 = vadd.f32 1.0, %v3263_v39  ;;  %v1967_v12 = vadd.f32 1.0, %v3265_v10  ;;  %v4273_v1 = vld [vmem:[#allocation6_spill] sm:$0xff] }
 0x340   : > { %v3267_v52 = vpop.eup %3266  ;;  %v1875_v24 = vadd.f32 %v1843_v36, %v4118_v59  ;;  %v1846_v42 = vmul.f32 %v1814_v27, %v4127_v2  ;;  %v1812_v13 = vmul.f32 %v1780_v60, %v4133_v41  ;;  %v4150_v16 = vadd.f32 %v4044_v34, %v3809_v6 }
 0x341   : > { %v2383_v21 = vadd.f32 %v2382_v0, %v2352_v14  ;;  %v2451_v53 = vadd.f32 %v2450_v47, %v2420_v37  ;;  %v1999_v18 = vmul.f32 %v1967_v12, %v1743_v29  ;;  %3270 = vtanh.f32 %v1909_v57 }
 0x342   : > { %v3269_v55 = vpop.eup %3268  ;;  %v1970_v15 = vadd.f32 1.0, %v3267_v52  ;;  %v1907_v33 = vmul.f32 0.7978846, %v1875_v24  ;;  %v1878_v38 = vadd.f32 %v1846_v42, %v4127_v2  ;;  %v1844_v49 = vmul.f32 %v1812_v13, %v4133_v41 }
 0x343   : > { %v2452_v35 = vadd.f32 %v2451_v53, %v2421_v5  ;;  %v2001_v61 = vmul.f32 %v1969_v32, %v4109_v20  ;;  %v2354_v54 = vmul.f32 %v3875_v48, %v1999_v18  ;;  %v2384_v11 = vadd.f32 %v2383_v21, %v2353_v58  ;;  %v4275_v5 = vld [vmem:[#allocation7_spill] sm:$0xff] }
 0x344   : > { %v2002_v28 = vmul.f32 %v1970_v15, %v1746_v62  ;;  %v1968_v34 = vadd.f32 1.0, %v3269_v55  ;;  %3272 = vtanh.f32 %v1907_v33  ;;  %v1910_v14 = vmul.f32 0.7978846, %v1878_v38 }
 0x345   : > { %v2385_v4 = vadd.f32 %v2384_v11, %v2354_v54  ;;  %v2423_v63 = vmul.f32 %v2354_v54, %v1999_v18  ;;  %v2453_v23 = vadd.f32 %v2452_v35, %v2422_v40  ;;  %v1876_v45 = vadd.f32 %v1844_v49, %v4133_v41 }
 0x346   : > { %v2836_v29 = vpack.c.bf16 %v2002_v28, %v2001_v61  ;;  %v2000_v22 = vmul.f32 %v1968_v34, %v1744_v30  ;;  %3274 = vtanh.f32 %v1910_v14  ;;  %v4159_v20 = vadd.s32 %v3731_v19, %v3906_v44 }
 0x347   : > { %v2454_v48 = vadd.f32 %v2453_v23, %v2423_v63  ;;  %v1908_v58 = vmul.f32 0.7978846, %v1876_v45  ;;  %v2231_v31 = vadd.s32 %v3731_v19, %v4007_v56  ;;  %v1785_v47 = vmul.f32 0.044715, %v4150_v16 }
 0x348   : > { %v2356_v62 = vmul.f32 %v4273_v1, %v2001_v61  ;;  %2868 = vst [vmem:[%s3532_s15 + $0x58] sm:$0xff] %v2836_v29   ;;  %v2831_v39 = vpack.c.bf16 %v2000_v22, %v1999_v18  ;;  %v2355_v25 = vmul.f32 %v4274_v43, %v2000_v22  ;;  %v4169_v30 = vadd.f32 %v3809_v6, %v4047_v50 }
 0x349   : > { %3276 = vtanh.f32 %v1908_v58  ;;  %v1817_v44 = vmul.f32 %v1785_v47, %v4150_v16  ;;  %v4174_v3 = vadd.f32 %v4052_v9, %v3809_v6  ;;  %v4178_v56 = vadd.f32 %v3809_v6, %v4055_v46 }
 0x34a   : > { %v2357_v40 = vmul.f32 %v4275_v5, %v2002_v28  ;;  %2867 = vst [vmem:[%s3532_s15 + $0x50] sm:$0xff] %v2831_v39   ;;  %v2386_v51 = vadd.f32 %v2385_v4, %v2355_v25  ;;  %v2424_v8 = vmul.f32 %v2355_v25, %v2000_v22  ;;  %v1783_v10 = vmul.f32 0.044715, %v4169_v30 }
 0x34b   : > { %v3271_v50 = vpop.eup %3270  ;;  %v4276_v57 = vmov 0.0   ;;  %vm2263_vm10 = vcmp.lt.s32.totalorder %v2231_v31, 300  ;;  %v1849_v9 = vmul.f32 %v1817_v44, %v4150_v16  ;;  %v1786_v27 = vmul.f32 0.044715, %v4174_v3  ;;  %v4277_v44 = vld [vmem:[#allocation9_spill] sm:$0xff] }
 0x34c   : > { %v2735_v36 = vsel %vm2262_vm9, 1.0, %v4276_v57  ;;  %v2425_v60 = vmul.f32 %v2356_v62, %v2001_v61  ;;  %v2387_v6 = vadd.f32 %v2386_v51, %v2356_v62  ;;  %v2455_v46 = vadd.f32 %v2454_v48, %v2424_v8 }
 0x34d   : > { %vm2265_vm11 = vcmp.lt.s32.totalorder %v4159_v20, 300  ;;  %v1815_v0 = vmul.f32 %v1783_v10, %v4169_v30  ;;  %v1747_v37 = vmul.f32 0.5, %v4118_v59  ;;  %v1881_v32 = vadd.f32 %v1849_v9, %v4150_v16 }
 0x34e   : > { %v1818_v12 = vmul.f32 %v1786_v27, %v4174_v3  ;;  %v1784_v26 = vmul.f32 0.044715, %v4178_v56  ;;  %v3273_v52 = vpop.eup %3272  ;;  %v2426_v24 = vmul.f32 %v2357_v40, %v2002_v28  ;;  %v2456_v42 = vadd.f32 %v2455_v46, %v2425_v60 }
 0x34f   : > { %v2388_v13 = vadd.f32 %v2387_v6, %v2357_v40  ;;  %v1847_v21 = vmul.f32 %v1815_v0, %v4169_v30  ;;  %v1973_v53 = vadd.f32 1.0, %v3271_v50  ;;  %v1971_v18 = vadd.f32 1.0, %v3273_v52 }
 0x350   : > { %v1913_v55 = vmul.f32 0.7978846, %v1881_v32  ;;  %v1850_v15 = vmul.f32 %v1818_v12, %v4174_v3  ;;  %v3275_v33 = vpop.eup %3274  ;;  %v2457_v38 = vadd.f32 %v2456_v42, %v2426_v24  ;;  %v2736_v59 = vsel %vm2263_vm10, 1.0, %v4276_v57 }
 0x351   : > { %v1879_v49 = vadd.f32 %v1847_v21, %v4169_v30  ;;  %v1816_v35 = vmul.f32 %v1784_v26, %v4178_v56  ;;  %v1749_v61 = vmul.f32 0.5, %v4103_v7  ;;  %v2003_v54 = vmul.f32 %v1971_v18, %v1747_v37 }
 0x352   : > { %v1750_v11 = vmul.f32 0.5, %v4127_v2  ;;  %v1974_v28 = vadd.f32 1.0, %v3275_v33  ;;  %3278 = vtanh.f32 %v1913_v55  ;;  %v1882_v14 = vadd.f32 %v1850_v15, %v4174_v3 }
 0x353   : > { %v1911_v34 = vmul.f32 0.7978846, %v1879_v49  ;;  %v1848_v4 = vmul.f32 %v1816_v35, %v4178_v56  ;;  %v3277_v63 = vpop.eup %3276  ;;  %v2005_v23 = vmul.f32 %v1973_v53, %v1749_v61  ;;  %v2358_v45 = vmul.f32 %v2735_v36, %v2003_v54 }
 0x354   : > { %v2006_v29 = vmul.f32 %v1974_v28, %v1750_v11  ;;  %v1748_v22 = vmul.f32 0.5, %v4133_v41  ;;  %v1972_v48 = vadd.f32 1.0, %v3277_v63  ;;  %v1914_v7 = vmul.f32 0.7978846, %v1882_v14 }
 0x355   : > { %3280 = vtanh.f32 %v1911_v34  ;;  %v1880_v58 = vadd.f32 %v1848_v4, %v4178_v56  ;;  %v2389_v2 = vadd.f32 %v2388_v13, %v2358_v45  ;;  %v2427_v31 = vmul.f32 %v2358_v45, %v2003_v54 }
 0x356   : > { %v2846_v47 = vpack.c.bf16 %v2006_v29, %v2005_v23  ;;  %v2200_v1 = vadd.s32 224, %v3727_v17  ;;  %v2004_v62 = vmul.f32 %v1972_v48, %v1748_v22  ;;  %3282 = vtanh.f32 %v1914_v7 }
 0x357   : > { %v1912_v39 = vmul.f32 0.7978846, %v1880_v58  ;;  %v2458_v43 = vadd.f32 %v2457_v38, %v2427_v31  ;;  %v2738_v41 = vsel %vm2265_vm11, 1.0, %v4276_v57  ;;  %v2202_v25 = vadd.s32 240, %v3727_v17 }
 0x358   : > { %2870 = vst [vmem:[%s3532_s15 + $0x68] sm:$0xff] %v2846_v47   ;;  %v2360_v5 = vmul.f32 %v4277_v44, %v2005_v23  ;;  %v2841_v40 = vpack.c.bf16 %v2004_v62, %v2003_v54  ;;  %v2359_v51 = vmul.f32 %v2736_v59, %v2004_v62  ;;  %v2234_v8 = vadd.s32 %v3731_v19, %v2200_v1 }
 0x359   : > { %3284 = vtanh.f32 %v1912_v39  ;;  %v2361_v10 = vmul.f32 %v2738_v41, %v2006_v29  ;;  %v2201_v9 = vadd.s32 232, %v3727_v17  ;;  %v2236_v27 = vadd.s32 %v3731_v19, %v2202_v25 }
 0x35a   : > { %2869 = vst [vmem:[%s3532_s15 + $0x60] sm:$0xff] %v2841_v40   ;;  %v2390_v50 = vadd.f32 %v2389_v2, %v2359_v51  ;;  %v2428_v36 = vmul.f32 %v2359_v51, %v2004_v62  ;;  %v2429_v20 = vmul.f32 %v2360_v5, %v2005_v23  ;;  %v2203_v0 = vadd.s32 248, %v3727_v17 }
 0x35b   : > { %vm2266_vm12 = vcmp.lt.s32.totalorder %v2234_v8, 300  ;;  %v2430_v32 = vmul.f32 %v2361_v10, %v2006_v29  ;;  %v2235_v52 = vadd.s32 %v3731_v19, %v2201_v9  ;;  %v1751_v42 = vmul.f32 0.5, %v4169_v30 }
 0x35c   : > { %v3279_v60 = vpop.eup %3278  ;;  %v2391_v6 = vadd.f32 %v2390_v50, %v2360_v5  ;;  %v2459_v46 = vadd.f32 %v2458_v43, %v2428_v36  ;;  %vm2268_vm13 = vcmp.lt.s32.totalorder %v2236_v27, 300  ;;  %v2739_v53 = vsel %vm2266_vm12, 1.0, %v4276_v57 }
 0x35d   : > { %v1977_v24 = vadd.f32 1.0, %v3279_v60  ;;  %v2237_v55 = vadd.s32 %v3731_v19, %v2203_v0  ;;  %v1753_v17 = vmul.f32 0.5, %v4150_v16  ;;  %v1754_v33 = vmul.f32 0.5, %v4174_v3 }
 0x35e   : > { %v2460_v12 = vadd.f32 %v2459_v46, %v2429_v20  ;;  %v2392_v26 = vadd.f32 %v2391_v6, %v2361_v10  ;;  %vm2267_vm14 = vcmp.lt.s32.totalorder %v2235_v52, 300  ;;  %v2741_v54 = vsel %vm2268_vm13, 1.0, %v4276_v57 }
 0x35f   : > { %v3281_v37 = vpop.eup %3280  ;;  %v2009_v49 = vmul.f32 %v1977_v24, %v1753_v17  ;;  %vm2269_vm15 = vcmp.lt.s32.totalorder %v2237_v55, 300  ;;  %v1752_v11 = vmul.f32 0.5, %v4178_v56  ;;  %v2740_v34 = vsel %vm2267_vm14, 1.0, %v4276_v57 }
 0x360   : > { %v1975_v13 = vadd.f32 1.0, %v3281_v37  ;;  %v3283_v21 = vpop.eup %3282  ;;  %v2461_v18 = vadd.f32 %v2460_v12, %v2430_v32  ;;  %v2742_v4 = vsel %vm2269_vm15, 1.0, %v4276_v57 }
 0x361   : > { %v1978_v38 = vadd.f32 1.0, %v3283_v21  ;;  %v2364_v63 = vmul.f32 %v2741_v54, %v2009_v49 }
 0x362   : > { %v2007_v15 = vmul.f32 %v1975_v13, %v1751_v42 }
 0x363   : > { %v3285_v59 = vpop.eup %3284  ;;  %v2010_v30 = vmul.f32 %v1978_v38, %v1754_v33  ;;  %v2433_v7 = vmul.f32 %v2364_v63, %v2009_v49 }
 0x364   : > { %v2362_v35 = vmul.f32 %v2739_v53, %v2007_v15  ;;  %v1976_v61 = vadd.f32 1.0, %v3285_v59 }
 0x365   : > { %v2856_v16 = vpack.c.bf16 %v2010_v30, %v2009_v49  ;;  %v2365_v29 = vmul.f32 %v2742_v4, %v2010_v30 }
 0x366   : > { %v2393_v19 = vadd.f32 %v2392_v26, %v2362_v35  ;;  %v2431_v28 = vmul.f32 %v2362_v35, %v2007_v15  ;;  %v2008_v3 = vmul.f32 %v1976_v61, %v1752_v11 }
 0x367   : > { %2872 = vst [vmem:[%s3532_s15 + $0x78] sm:$0xff] %v2856_v16   ;;  %v2434_v2 = vmul.f32 %v2365_v29, %v2010_v30 }
 0x368   : > { %v2462_v14 = vadd.f32 %v2461_v18, %v2431_v28  ;;  %v2851_v23 = vpack.c.bf16 %v2008_v3, %v2007_v15  ;;  %v2363_v45 = vmul.f32 %v2740_v34, %v2008_v3 }
 0x36a   : > { %2871 = vst [vmem:[%s3532_s15 + $0x70] sm:$0xff] %v2851_v23   ;;  %v2394_v22 = vadd.f32 %v2393_v19, %v2363_v45  ;;  %v2432_v48 = vmul.f32 %v2363_v45, %v2008_v3 }
 0x36c   : > { %v2395_v58 = vadd.f32 %v2394_v22, %v2364_v63  ;;  %v2463_v56 = vadd.f32 %v2462_v14, %v2432_v48 }
 0x36e   : > { %v2396_v31 = vadd.f32 %v2395_v58, %v2365_v29  ;;  %v2464_v47 = vadd.f32 %v2463_v56, %v2433_v7 }
 0x370   : > { %v2397_v1 = vrot.slane %v2396_v31, 4  ;;  %v2465_v62 = vadd.f32 %v2464_v47, %v2434_v2 }
 0x372   : > { %v2398_v39 = vadd.f32 %v2397_v1, %v2396_v31  ;;  %v2466_v43 = vrot.slane %v2465_v62, 4 }
 0x374   : > { %v2399_v41 = vrot.slane %v2398_v39, 2  ;;  %v2467_v57 = vadd.f32 %v2466_v43, %v2465_v62 }
 0x376   : > { %v2400_v25 = vadd.f32 %v2399_v41, %v2398_v39  ;;  %v2468_v44 = vrot.slane %v2467_v57, 2 }
 0x378   : > { %v2401_v5 = vrot.slane %v2400_v25, 1  ;;  %v2469_v40 = vadd.f32 %v2468_v44, %v2467_v57 }
 0x37a   : > { %v2470_v51 = vrot.slane %v2469_v40, 1  ;;  %v2402_v8 = vadd.f32 %v2401_v5, %v2400_v25 }
 0x37c   : > { %v2471_v10 = vadd.f32 %v2470_v51, %v2469_v40 }
 0x37e   : > { %v2473_v50 = vsel %vm2472_vm0, %v2402_v8, %v2471_v10 }
 0x37f   : > { %v2475_v36 = vsel %vm2474_vm1, %v2473_v50, 0.0 }
 0x380   : > { %2476 = vst [vmem:[%s3537_s16] sm:$0xff] %v2475_v36 }
 0x381 PF: > { %s19_s11 = sadd.s32 1, %s3340_s11   ;;  %s4278_s15 = sld [smem:[#allocation4_spill]] }
 0x382   : > { %p16_p0 = scmp.ge.s32.totalorder %s19_s11, 6   ;;  %s4279_s0 = sld [smem:[#allocation5_spill]] }
 0x383   : > { %s4280_s27 = smov %s3320_s28  ;;  %s4281_s28 = smov %s3441_s18 }
 0x384   : > { %s4282_s29 = smov %s3332_s9  ;;  %s4283_s30 = smov %s3336_s10 }
 0x385   :  { %18 = sbr.rel (!%p16_p0) target bundleno = 6 (0x6), region = 145 }
 0x387   : > { %s4284_s9 = smov %s4278_s15 }
 0x388   : > { %s4285_s10 = smov %s4279_s0 }

</bundles_post_ra>
